<compile_context>
chip_gen: v5e
topology: v5e:2x2
jax: 0.10.0
libtpu: 0.0.40
codegen_flags: <defaults>
</compile_context>

<pallas_src>
import math

import jax
import jax.numpy as jnp
from jax.experimental import pallas as pl
from jax.experimental.pallas import tpu as pltpu

# ----------------------------- configuration --------------------------------
B = 2                 # batch
MAX_LENGTH = 8        # text sequence length
VOCAB = 128           # synthetic vocab (bert-base: 30522)
H = 128               # hidden size (bert-base: 768) — lane aligned
LAYERS = 2            # encoder layers (bert-base: 12)
HEADS = 4             # attention heads (bert-base: 12)
HD = H // HEADS       # head dim = 32
INTER = 4 * H         # intermediate size = 512 (bert-base: 3072)
LN_EPS = 1e-12
SCALE = 1.0 / math.sqrt(HD)


# ----------------------------- fused BERT kernel ----------------------------
def _bert_kernel(
    emb_ref, mask_ref, embg_ref, embb_ref,
    wqkv_ref, bqkv_ref, wattn_ref, battn_ref, ln1g_ref, ln1b_ref,
    wint_ref, bint_ref, wout_ref, bout_ref, ln2g_ref, ln2b_ref,
    wpool_ref, bpool_ref,
    hid_ref, pool_ref,
):
    layer = pl.program_id(0)
    n_layers = pl.num_programs(0)
    Bk, Sk, Hk = hid_ref.shape            # static block shape (B, S, H)

    def ln(v, g, b):
        mu = jnp.mean(v, axis=-1, keepdims=True)
        d = v - mu
        var = jnp.mean(d * d, axis=-1, keepdims=True)
        return d * jax.lax.rsqrt(var + LN_EPS) * g + b

    def mm(a, w):
        # bf16 MXU operands, f32 accumulation.
        return jnp.dot(a.astype(jnp.bfloat16), w.astype(jnp.bfloat16),
                       preferred_element_type=jnp.float32)

    # Layer 0: fused embedding LayerNorm seeds the VMEM-resident carry block.
    @pl.when(layer == 0)
    def _():
        hid_ref[...] = ln(emb_ref[...], embg_ref[...], embb_ref[...])

    x = hid_ref[...]                      # (B, S, H) carry from previous layer
    bias = mask_ref[...]                  # (B, 1, S) additive attention bias

    # ---- self-attention: single fused QKV matmul over all B*S tokens ----
    x2d = x.reshape(Bk * Sk, Hk)
    qkv2d = mm(x2d, wqkv_ref[0]) + bqkv_ref[0]        # (B*S, 3H)
    qkv = qkv2d.reshape(Bk, Sk, 3 * Hk)

    w_attn = wattn_ref[0]                 # (H, H) output projection weight
    attn = battn_ref[0]                   # (1, H) output projection bias
    for h in range(HEADS):
        q = qkv[:, :, h * HD:(h + 1) * HD]                      # (B, S, HD)
        k = qkv[:, :, Hk + h * HD:Hk + (h + 1) * HD]            # (B, S, HD)
        v = qkv[:, :, 2 * Hk + h * HD:2 * Hk + (h + 1) * HD]    # (B, S, HD)
        s = jnp.einsum('bqd,bkd->bqk',
                       q.astype(jnp.bfloat16), k.astype(jnp.bfloat16),
                       preferred_element_type=jnp.float32) * SCALE
        s = s + bias
        s = s - jnp.max(s, axis=-1, keepdims=True)
        p = jnp.exp(s)
        p = p * pl.reciprocal(jnp.sum(p, axis=-1, keepdims=True), approx=True)
        ctx = jnp.einsum('bqk,bkd->bqd',
                         p.astype(jnp.bfloat16), v.astype(jnp.bfloat16),
                         preferred_element_type=jnp.float32)    # (B, S, HD)
        # Accumulate this head's slice of the output projection (no concat).
        attn = attn + mm(ctx.reshape(Bk * Sk, HD),
                         w_attn[h * HD:(h + 1) * HD, :])
    x1 = ln(x2d + attn, ln1g_ref[0], ln1b_ref[0])     # (B*S, H)

    # ---- feed-forward with exact erf-gelu (BERT "gelu") ----
    hdn = mm(x1, wint_ref[0]) + bint_ref[0]
    hdn = hdn * 0.5 * (1.0 + jax.lax.erf(hdn * (1.0 / math.sqrt(2.0))))
    ffn = mm(hdn, wout_ref[0]) + bout_ref[0]
    x2 = ln(x1 + ffn, ln2g_ref[0], ln2b_ref[0])       # (B*S, H)

    hid_ref[...] = x2.reshape(Bk, Sk, Hk)             # carry / last_hidden_state

    # ---- pooler: dense + tanh on the [CLS] token, only at the last layer ----
    @pl.when(layer == n_layers - 1)
    def _():
        cls = x2.reshape(Bk, Sk, Hk)[:, 0, :]                    # (B, H)
        pooled = jnp.tanh(mm(cls, wpool_ref[...]) + bpool_ref[...])
        pool_ref[...] = pooled.reshape(Bk, 1, Hk)


def bert_forward(params, input_ids, attention_mask):
    """BertModel forward: returns (last_hidden_state, pooled_output)."""
    Bx, S = input_ids.shape
    H3 = 3 * H

    # Embedding gather + position/type embeddings (JAX glue; LN is in-kernel).
    emb = (jnp.take(params["word_emb"], input_ids, axis=0)
           + params["pos_emb"][None, :S, :]
           + params["type_emb"][0][None, None, :]).astype(jnp.float32)
    mask_bias = ((1.0 - attention_mask.astype(jnp.float32)) * -10000.0)
    mask_bias = mask_bias[:, None, :]                           # (B, 1, S)

    n_layers = params["wqkv"].shape[0]

    # Matmul weights streamed in bf16 (halves HBM weight traffic); biases and
    # LayerNorm parameters stay f32.
    bf = lambda a: a.astype(jnp.bfloat16)

    wmap = lambda l: (l, 0, 0)      # per-layer stacked weights
    c3 = lambda l: (0, 0, 0)        # whole-array 3-D blocks (resident)
    c2 = lambda l: (0, 0)           # shared 2-D params

    in_specs = [
        pl.BlockSpec((Bx, S, H), c3),         # emb
        pl.BlockSpec((Bx, 1, S), c3),         # attention mask bias
        pl.BlockSpec((1, H), c2),             # embedding LN gamma
        pl.BlockSpec((1, H), c2),             # embedding LN beta
        pl.BlockSpec((1, H, H3), wmap),       # fused QKV weight
        pl.BlockSpec((1, 1, H3), wmap),       # fused QKV bias
        pl.BlockSpec((1, H, H), wmap),        # attention output weight
        pl.BlockSpec((1, 1, H), wmap),        # attention output bias
        pl.BlockSpec((1, 1, H), wmap),        # LN1 gamma
        pl.BlockSpec((1, 1, H), wmap),        # LN1 beta
        pl.BlockSpec((1, H, INTER), wmap),    # intermediate weight
        pl.BlockSpec((1, 1, INTER), wmap),    # intermediate bias
        pl.BlockSpec((1, INTER, H), wmap),    # output weight
        pl.BlockSpec((1, 1, H), wmap),        # output bias
        pl.BlockSpec((1, 1, H), wmap),        # LN2 gamma
        pl.BlockSpec((1, 1, H), wmap),        # LN2 beta
        pl.BlockSpec((H, H), c2),             # pooler weight
        pl.BlockSpec((1, H), c2),             # pooler bias
    ]
    out_specs = [
        pl.BlockSpec((Bx, S, H), c3),         # last_hidden_state (carry)
        pl.BlockSpec((Bx, 1, H), c3),         # pooled output
    ]
    out_shape = [
        jax.ShapeDtypeStruct((Bx, S, H), jnp.float32),
        jax.ShapeDtypeStruct((Bx, 1, H), jnp.float32),
    ]

    hidden, pooled = pl.pallas_call(
        _bert_kernel,
        grid=(n_layers,),
        in_specs=in_specs,
        out_specs=out_specs,
        out_shape=out_shape,
        compiler_params=pltpu.CompilerParams(
            dimension_semantics=("arbitrary",)),
    )(emb, mask_bias,
      params["emb_ln_g"], params["emb_ln_b"],
      bf(params["wqkv"]), params["bqkv"],
      bf(params["w_attn_out"]), params["b_attn_out"],
      params["ln1_g"], params["ln1_b"],
      bf(params["w_int"]), params["b_int"],
      bf(params["w_out"]), params["b_out"],
      params["ln2_g"], params["ln2_b"],
      bf(params["w_pool"]), params["b_pool"])
    return hidden, pooled[:, 0, :]


# --------------------------- deterministic init ------------------------------
def init_params(key):
    keys = iter(jax.random.split(key, 64))

    def nrm(shape):
        return jax.random.normal(next(keys), shape, jnp.float32) * 0.02

    return dict(
        word_emb=nrm((VOCAB, H)),
        pos_emb=nrm((MAX_LENGTH, H)),
        type_emb=nrm((2, H)),
        emb_ln_g=jnp.ones((1, H), jnp.float32),
        emb_ln_b=jnp.zeros((1, H), jnp.float32),
        # per-layer weights, stacked on a leading layer axis
        wqkv=nrm((LAYERS, H, 3 * H)),
        bqkv=nrm((LAYERS, 1, 3 * H)),
        w_attn_out=nrm((LAYERS, H, H)),
        b_attn_out=nrm((LAYERS, 1, H)),
        ln1_g=jnp.ones((LAYERS, 1, H), jnp.float32),
        ln1_b=jnp.zeros((LAYERS, 1, H), jnp.float32),
        w_int=nrm((LAYERS, H, INTER)),
        b_int=nrm((LAYERS, 1, INTER)),
        w_out=nrm((LAYERS, INTER, H)),
        b_out=nrm((LAYERS, 1, H)),
        ln2_g=jnp.ones((LAYERS, 1, H), jnp.float32),
        ln2_b=jnp.zeros((LAYERS, 1, H), jnp.float32),
        w_pool=nrm((H, H)),
        b_pool=nrm((1, H)),
    )


# ------------------------------------ main -----------------------------------
if __name__ == "__main__":
    root = jax.random.PRNGKey(0)
    kp, kt = jax.random.split(root, 2)

    params = init_params(kp)
    input_ids = jax.random.randint(kt, (B, MAX_LENGTH), 0, VOCAB, dtype=jnp.int32)
    attention_mask = jnp.ones((B, MAX_LENGTH), dtype=jnp.int32)

    fwd = jax.jit(bert_forward)
    hidden, pooled = fwd(params, input_ids, attention_mask)
    hidden = jax.block_until_ready(hidden)
    pooled = jax.block_until_ready(pooled)

    assert hidden.shape == (B, MAX_LENGTH, H), hidden.shape
    assert pooled.shape == (B, H), pooled.shape
    assert bool(jnp.all(jnp.isfinite(hidden)))
    assert bool(jnp.all(jnp.isfinite(pooled)))
    print("KERNEL_OK")
</pallas_src>

<mosaic_0001>
module attributes {stable_mosaic.version = 11 : i64} {
  func.func @_bert_kernel(%arg0: i32, %arg1: memref<2x8x128xf32, #tpu.memory_space<vmem>>, %arg2: memref<2x1x8xf32, #tpu.memory_space<vmem>>, %arg3: memref<1x128xf32, #tpu.memory_space<vmem>>, %arg4: memref<1x128xf32, #tpu.memory_space<vmem>>, %arg5: memref<1x128x384xbf16, #tpu.memory_space<vmem>>, %arg6: memref<1x1x384xf32, #tpu.memory_space<vmem>>, %arg7: memref<1x128x128xbf16, #tpu.memory_space<vmem>>, %arg8: memref<1x1x128xf32, #tpu.memory_space<vmem>>, %arg9: memref<1x1x128xf32, #tpu.memory_space<vmem>>, %arg10: memref<1x1x128xf32, #tpu.memory_space<vmem>>, %arg11: memref<1x128x512xbf16, #tpu.memory_space<vmem>>, %arg12: memref<1x1x512xf32, #tpu.memory_space<vmem>>, %arg13: memref<1x512x128xbf16, #tpu.memory_space<vmem>>, %arg14: memref<1x1x128xf32, #tpu.memory_space<vmem>>, %arg15: memref<1x1x128xf32, #tpu.memory_space<vmem>>, %arg16: memref<1x1x128xf32, #tpu.memory_space<vmem>>, %arg17: memref<128x128xbf16, #tpu.memory_space<vmem>>, %arg18: memref<1x128xf32, #tpu.memory_space<vmem>>, %arg19: memref<2x8x128xf32, #tpu.memory_space<vmem>>, %arg20: memref<2x1x128xf32, #tpu.memory_space<vmem>>) attributes {dimension_semantics = [#tpu.dimension_semantics<arbitrary>], iteration_bounds = array<i64: 2>, scalar_prefetch = 0 : i64, scratch_operands = 0 : i64, tpu.core_type = #tpu.core_type<tc>, window_params = [{pipeline_mode = #tpu.pipeline_mode<synchronous>, transform_indices = @transform_0, window_bounds = array<i64: 2, 8, 128>}, {pipeline_mode = #tpu.pipeline_mode<synchronous>, transform_indices = @transform_1, window_bounds = array<i64: 2, 1, 8>}, {pipeline_mode = #tpu.pipeline_mode<synchronous>, transform_indices = @transform_2, window_bounds = array<i64: 1, 128>}, {pipeline_mode = #tpu.pipeline_mode<synchronous>, transform_indices = @transform_3, window_bounds = array<i64: 1, 128>}, {transform_indices = @transform_4, window_bounds = array<i64: 1, 128, 384>}, {transform_indices = @transform_5, window_bounds = array<i64: 1, 1, 384>}, {transform_indices = @transform_6, window_bounds = array<i64: 1, 128, 128>}, {transform_indices = @transform_7, window_bounds = array<i64: 1, 1, 128>}, {transform_indices = @transform_8, window_bounds = array<i64: 1, 1, 128>}, {transform_indices = @transform_9, window_bounds = array<i64: 1, 1, 128>}, {transform_indices = @transform_10, window_bounds = array<i64: 1, 128, 512>}, {transform_indices = @transform_11, window_bounds = array<i64: 1, 1, 512>}, {transform_indices = @transform_12, window_bounds = array<i64: 1, 512, 128>}, {transform_indices = @transform_13, window_bounds = array<i64: 1, 1, 128>}, {transform_indices = @transform_14, window_bounds = array<i64: 1, 1, 128>}, {transform_indices = @transform_15, window_bounds = array<i64: 1, 1, 128>}, {pipeline_mode = #tpu.pipeline_mode<synchronous>, transform_indices = @transform_16, window_bounds = array<i64: 128, 128>}, {pipeline_mode = #tpu.pipeline_mode<synchronous>, transform_indices = @transform_17, window_bounds = array<i64: 1, 128>}, {pipeline_mode = #tpu.pipeline_mode<synchronous>, transform_indices = @transform_18, window_bounds = array<i64: 2, 8, 128>}, {pipeline_mode = #tpu.pipeline_mode<synchronous>, transform_indices = @transform_19, window_bounds = array<i64: 2, 1, 128>}]} {
    %c0_i32 = arith.constant 0 : i32
    %0 = arith.cmpi eq, %arg0, %c0_i32 : i32
    %1 = arith.extui %0 : i1 to i32
    %c0_i32_0 = arith.constant 0 : i32
    %2 = arith.cmpi ne, %1, %c0_i32_0 : i32
    scf.if %2 {
      %c0_85 = arith.constant 0 : index
      %c0_86 = arith.constant 0 : index
      %c0_87 = arith.constant 0 : index
      %211 = vector.load %arg1[%c0_85, %c0_86, %c0_87] : memref<2x8x128xf32, #tpu.memory_space<vmem>>, vector<2x8x128xf32>
      %c0_88 = arith.constant 0 : index
      %c0_89 = arith.constant 0 : index
      %212 = vector.load %arg3[%c0_88, %c0_89] : memref<1x128xf32, #tpu.memory_space<vmem>>, vector<1x128xf32>
      %c0_90 = arith.constant 0 : index
      %c0_91 = arith.constant 0 : index
      %213 = vector.load %arg4[%c0_90, %c0_91] : memref<1x128xf32, #tpu.memory_space<vmem>>, vector<1x128xf32>
      %cst_92 = arith.constant dense<0.000000e+00> : vector<2x8xf32>
      %214 = vector.multi_reduction <add>, %211, %cst_92 [2] : vector<2x8x128xf32> to vector<2x8xf32>
      %215 = vector.shape_cast %214 : vector<2x8xf32> to vector<2x8x1xf32>
      %cst_93 = arith.constant 1.280000e+02 : f32
      %216 = vector.broadcast %cst_93 : f32 to vector<2x8x1xf32>
      %217 = arith.divf %215, %216 : vector<2x8x1xf32>
      %218 = vector.broadcast %217 : vector<2x8x1xf32> to vector<2x8x128xf32>
      %219 = arith.subf %211, %218 : vector<2x8x128xf32>
      %220 = arith.mulf %219, %219 : vector<2x8x128xf32>
      %cst_94 = arith.constant dense<0.000000e+00> : vector<2x8xf32>
      %221 = vector.multi_reduction <add>, %220, %cst_94 [2] : vector<2x8x128xf32> to vector<2x8xf32>
      %222 = vector.shape_cast %221 : vector<2x8xf32> to vector<2x8x1xf32>
      %cst_95 = arith.constant 1.280000e+02 : f32
      %223 = vector.broadcast %cst_95 : f32 to vector<2x8x1xf32>
      %224 = arith.divf %222, %223 : vector<2x8x1xf32>
      %cst_96 = arith.constant 9.99999996E-13 : f32
      %225 = vector.broadcast %cst_96 : f32 to vector<2x8x1xf32>
      %226 = arith.addf %224, %225 : vector<2x8x1xf32>
      %227 = math.rsqrt %226 : vector<2x8x1xf32>
      %228 = vector.broadcast %227 : vector<2x8x1xf32> to vector<2x8x128xf32>
      %229 = arith.mulf %219, %228 : vector<2x8x128xf32>
      %230 = vector.shape_cast %212 : vector<1x128xf32> to vector<1x1x128xf32>
      %231 = vector.broadcast %230 : vector<1x1x128xf32> to vector<2x8x128xf32>
      %232 = arith.mulf %229, %231 : vector<2x8x128xf32>
      %233 = vector.shape_cast %213 : vector<1x128xf32> to vector<1x1x128xf32>
      %234 = vector.broadcast %233 : vector<1x1x128xf32> to vector<2x8x128xf32>
      %235 = arith.addf %232, %234 : vector<2x8x128xf32>
      %c0_97 = arith.constant 0 : index
      %c0_98 = arith.constant 0 : index
      %c0_99 = arith.constant 0 : index
      %236 = vector.load %arg19[%c0_97, %c0_98, %c0_99] : memref<2x8x128xf32, #tpu.memory_space<vmem>>, vector<2x8x128xf32>
      tpu.vector_store %arg19[%c0_97, %c0_98, %c0_99], %235 {strides = array<i32>} : memref<2x8x128xf32, #tpu.memory_space<vmem>>, vector<2x8x128xf32>,
    } else {
    }
    %c0 = arith.constant 0 : index
    %c0_1 = arith.constant 0 : index
    %c0_2 = arith.constant 0 : index
    %3 = vector.load %arg19[%c0, %c0_1, %c0_2] : memref<2x8x128xf32, #tpu.memory_space<vmem>>, vector<2x8x128xf32>
    %c0_3 = arith.constant 0 : index
    %c0_4 = arith.constant 0 : index
    %c0_5 = arith.constant 0 : index
    %4 = vector.load %arg2[%c0_3, %c0_4, %c0_5] : memref<2x1x8xf32, #tpu.memory_space<vmem>>, vector<2x1x8xf32>
    %5 = vector.shape_cast %3 : vector<2x8x128xf32> to vector<16x128xf32>
    %c0_6 = arith.constant 0 : index
    %c0_7 = arith.constant 0 : index
    %c0_8 = arith.constant 0 : index
    %6 = vector.load %arg5[%c0_6, %c0_7, %c0_8] : memref<1x128x384xbf16, #tpu.memory_space<vmem>>, vector<1x128x384xbf16>
    %7 = vector.shape_cast %6 : vector<1x128x384xbf16> to vector<128x384xbf16>
    %8 = arith.truncf %5 : vector<16x128xf32> to vector<16x128xbf16>
    %cst = arith.constant dense<0.000000e+00> : vector<16x384xf32>
    %9 = tpu.matmul %8, %7, %cst {dimension_numbers = #tpu.dot_dimension_numbers<[1], [0], [0], [1], [0, 0, 1, 1], [], []>} : vector<16x128xbf16>, vector<128x384xbf16>, vector<16x384xf32> -> vector<16x384xf32>
    %c0_9 = arith.constant 0 : index
    %c0_10 = arith.constant 0 : index
    %c0_11 = arith.constant 0 : index
    %10 = vector.load %arg6[%c0_9, %c0_10, %c0_11] : memref<1x1x384xf32, #tpu.memory_space<vmem>>, vector<1x1x384xf32>
    %11 = vector.shape_cast %10 : vector<1x1x384xf32> to vector<1x384xf32>
    %12 = vector.broadcast %11 : vector<1x384xf32> to vector<16x384xf32>
    %13 = arith.addf %9, %12 : vector<16x384xf32>
    %14 = vector.shape_cast %13 : vector<16x384xf32> to vector<2x8x384xf32>
    %c0_12 = arith.constant 0 : index
    %c0_13 = arith.constant 0 : index
    %c0_14 = arith.constant 0 : index
    %15 = vector.load %arg7[%c0_12, %c0_13, %c0_14] : memref<1x128x128xbf16, #tpu.memory_space<vmem>>, vector<1x128x128xbf16>
    %16 = vector.shape_cast %15 : vector<1x128x128xbf16> to vector<128x128xbf16>
    %c0_15 = arith.constant 0 : index
    %c0_16 = arith.constant 0 : index
    %c0_17 = arith.constant 0 : index
    %17 = vector.load %arg8[%c0_15, %c0_16, %c0_17] : memref<1x1x128xf32, #tpu.memory_space<vmem>>, vector<1x1x128xf32>
    %18 = vector.shape_cast %17 : vector<1x1x128xf32> to vector<1x128xf32>
    %19 = vector.extract_strided_slice %14 {offsets = [0, 0, 0], sizes = [2, 8, 32], strides = [1, 1, 1]} : vector<2x8x384xf32> to vector<2x8x32xf32>
    %20 = vector.extract_strided_slice %14 {offsets = [0, 0, 128], sizes = [2, 8, 32], strides = [1, 1, 1]} : vector<2x8x384xf32> to vector<2x8x32xf32>
    %21 = vector.extract_strided_slice %14 {offsets = [0, 0, 256], sizes = [2, 8, 32], strides = [1, 1, 1]} : vector<2x8x384xf32> to vector<2x8x32xf32>
    %22 = arith.truncf %19 : vector<2x8x32xf32> to vector<2x8x32xbf16>
    %23 = arith.truncf %20 : vector<2x8x32xf32> to vector<2x8x32xbf16>
    "tpu.trace_start"() <{level = 10 : i32, message = "bqd,bkd->bqk"}> : () -> ()
    %cst_18 = arith.constant dense<0.000000e+00> : vector<2x8x8xf32>
    %24 = tpu.matmul %22, %23, %cst_18 {dimension_numbers = #tpu.dot_dimension_numbers<[2], [2], [1], [1], [0, 0, 0, 1, 1, 1], [0], [0]>} : vector<2x8x32xbf16>, vector<2x8x32xbf16>, vector<2x8x8xf32> -> vector<2x8x8xf32>
    "tpu.trace_stop"() : () -> ()
    %cst_19 = arith.constant 0.176776692 : f32
    %25 = vector.broadcast %cst_19 : f32 to vector<2x8x8xf32>
    %26 = arith.mulf %24, %25 : vector<2x8x8xf32>
    %27 = vector.broadcast %4 : vector<2x1x8xf32> to vector<2x8x8xf32>
    %28 = arith.addf %26, %27 : vector<2x8x8xf32>
    %cst_20 = arith.constant dense<0xFF800000> : vector<2x8xf32>
    %29 = vector.multi_reduction <maximumf>, %28, %cst_20 [2] : vector<2x8x8xf32> to vector<2x8xf32>
    %30 = vector.shape_cast %29 : vector<2x8xf32> to vector<2x8x1xf32>
    %31 = vector.broadcast %30 : vector<2x8x1xf32> to vector<2x8x8xf32>
    %32 = arith.subf %28, %31 : vector<2x8x8xf32>
    %33 = math.exp %32 : vector<2x8x8xf32>
    %cst_21 = arith.constant dense<0.000000e+00> : vector<2x8xf32>
    %34 = vector.multi_reduction <add>, %33, %cst_21 [2] : vector<2x8x8xf32> to vector<2x8xf32>
    %35 = vector.shape_cast %34 : vector<2x8xf32> to vector<2x8x1xf32>
    %36 = tpu.reciprocal %35 {approx = true} : vector<2x8x1xf32> -> vector<2x8x1xf32>
    %37 = vector.broadcast %36 : vector<2x8x1xf32> to vector<2x8x8xf32>
    %38 = arith.mulf %33, %37 : vector<2x8x8xf32>
    %39 = arith.truncf %38 : vector<2x8x8xf32> to vector<2x8x8xbf16>
    %40 = arith.truncf %21 : vector<2x8x32xf32> to vector<2x8x32xbf16>
    "tpu.trace_start"() <{level = 10 : i32, message = "bqk,bkd->bqd"}> : () -> ()
    %cst_22 = arith.constant dense<0.000000e+00> : vector<2x8x32xf32>
    %41 = tpu.matmul %39, %40, %cst_22 {dimension_numbers = #tpu.dot_dimension_numbers<[2], [1], [1], [2], [0, 0, 0, 1, 1, 2], [0], [0]>} : vector<2x8x8xbf16>, vector<2x8x32xbf16>, vector<2x8x32xf32> -> vector<2x8x32xf32>
    "tpu.trace_stop"() : () -> ()
    %42 = vector.shape_cast %41 : vector<2x8x32xf32> to vector<16x32xf32>
    %43 = vector.extract_strided_slice %16 {offsets = [0, 0], sizes = [32, 128], strides = [1, 1]} : vector<128x128xbf16> to vector<32x128xbf16>
    %44 = arith.truncf %42 : vector<16x32xf32> to vector<16x32xbf16>
    %cst_23 = arith.constant dense<0.000000e+00> : vector<16x128xf32>
    %45 = tpu.matmul %44, %43, %cst_23 {dimension_numbers = #tpu.dot_dimension_numbers<[1], [0], [0], [1], [0, 0, 1, 1], [], []>} : vector<16x32xbf16>, vector<32x128xbf16>, vector<16x128xf32> -> vector<16x128xf32>
    %46 = vector.broadcast %18 : vector<1x128xf32> to vector<16x128xf32>
    %47 = arith.addf %46, %45 : vector<16x128xf32>
    %48 = vector.extract_strided_slice %14 {offsets = [0, 0, 32], sizes = [2, 8, 32], strides = [1, 1, 1]} : vector<2x8x384xf32> to vector<2x8x32xf32>
    %49 = vector.extract_strided_slice %14 {offsets = [0, 0, 160], sizes = [2, 8, 32], strides = [1, 1, 1]} : vector<2x8x384xf32> to vector<2x8x32xf32>
    %50 = vector.extract_strided_slice %14 {offsets = [0, 0, 288], sizes = [2, 8, 32], strides = [1, 1, 1]} : vector<2x8x384xf32> to vector<2x8x32xf32>
    %51 = arith.truncf %48 : vector<2x8x32xf32> to vector<2x8x32xbf16>
    %52 = arith.truncf %49 : vector<2x8x32xf32> to vector<2x8x32xbf16>
    "tpu.trace_start"() <{level = 10 : i32, message = "bqd,bkd->bqk"}> : () -> ()
    %cst_24 = arith.constant dense<0.000000e+00> : vector<2x8x8xf32>
    %53 = tpu.matmul %51, %52, %cst_24 {dimension_numbers = #tpu.dot_dimension_numbers<[2], [2], [1], [1], [0, 0, 0, 1, 1, 1], [0], [0]>} : vector<2x8x32xbf16>, vector<2x8x32xbf16>, vector<2x8x8xf32> -> vector<2x8x8xf32>
    "tpu.trace_stop"() : () -> ()
    %cst_25 = arith.constant 0.176776692 : f32
    %54 = vector.broadcast %cst_25 : f32 to vector<2x8x8xf32>
    %55 = arith.mulf %53, %54 : vector<2x8x8xf32>
    %56 = vector.broadcast %4 : vector<2x1x8xf32> to vector<2x8x8xf32>
    %57 = arith.addf %55, %56 : vector<2x8x8xf32>
    %cst_26 = arith.constant dense<0xFF800000> : vector<2x8xf32>
    %58 = vector.multi_reduction <maximumf>, %57, %cst_26 [2] : vector<2x8x8xf32> to vector<2x8xf32>
    %59 = vector.shape_cast %58 : vector<2x8xf32> to vector<2x8x1xf32>
    %60 = vector.broadcast %59 : vector<2x8x1xf32> to vector<2x8x8xf32>
    %61 = arith.subf %57, %60 : vector<2x8x8xf32>
    %62 = math.exp %61 : vector<2x8x8xf32>
    %cst_27 = arith.constant dense<0.000000e+00> : vector<2x8xf32>
    %63 = vector.multi_reduction <add>, %62, %cst_27 [2] : vector<2x8x8xf32> to vector<2x8xf32>
    %64 = vector.shape_cast %63 : vector<2x8xf32> to vector<2x8x1xf32>
    %65 = tpu.reciprocal %64 {approx = true} : vector<2x8x1xf32> -> vector<2x8x1xf32>
    %66 = vector.broadcast %65 : vector<2x8x1xf32> to vector<2x8x8xf32>
    %67 = arith.mulf %62, %66 : vector<2x8x8xf32>
    %68 = arith.truncf %67 : vector<2x8x8xf32> to vector<2x8x8xbf16>
    %69 = arith.truncf %50 : vector<2x8x32xf32> to vector<2x8x32xbf16>
    "tpu.trace_start"() <{level = 10 : i32, message = "bqk,bkd->bqd"}> : () -> ()
    %cst_28 = arith.constant dense<0.000000e+00> : vector<2x8x32xf32>
    %70 = tpu.matmul %68, %69, %cst_28 {dimension_numbers = #tpu.dot_dimension_numbers<[2], [1], [1], [2], [0, 0, 0, 1, 1, 2], [0], [0]>} : vector<2x8x8xbf16>, vector<2x8x32xbf16>, vector<2x8x32xf32> -> vector<2x8x32xf32>
    "tpu.trace_stop"() : () -> ()
    %71 = vector.shape_cast %70 : vector<2x8x32xf32> to vector<16x32xf32>
    %72 = vector.extract_strided_slice %16 {offsets = [32, 0], sizes = [32, 128], strides = [1, 1]} : vector<128x128xbf16> to vector<32x128xbf16>
    %73 = arith.truncf %71 : vector<16x32xf32> to vector<16x32xbf16>
    %cst_29 = arith.constant dense<0.000000e+00> : vector<16x128xf32>
    %74 = tpu.matmul %73, %72, %cst_29 {dimension_numbers = #tpu.dot_dimension_numbers<[1], [0], [0], [1], [0, 0, 1, 1], [], []>} : vector<16x32xbf16>, vector<32x128xbf16>, vector<16x128xf32> -> vector<16x128xf32>
    %75 = arith.addf %47, %74 : vector<16x128xf32>
    %76 = vector.extract_strided_slice %14 {offsets = [0, 0, 64], sizes = [2, 8, 32], strides = [1, 1, 1]} : vector<2x8x384xf32> to vector<2x8x32xf32>
    %77 = vector.extract_strided_slice %14 {offsets = [0, 0, 192], sizes = [2, 8, 32], strides = [1, 1, 1]} : vector<2x8x384xf32> to vector<2x8x32xf32>
    %78 = vector.extract_strided_slice %14 {offsets = [0, 0, 320], sizes = [2, 8, 32], strides = [1, 1, 1]} : vector<2x8x384xf32> to vector<2x8x32xf32>
    %79 = arith.truncf %76 : vector<2x8x32xf32> to vector<2x8x32xbf16>
    %80 = arith.truncf %77 : vector<2x8x32xf32> to vector<2x8x32xbf16>
    "tpu.trace_start"() <{level = 10 : i32, message = "bqd,bkd->bqk"}> : () -> ()
    %cst_30 = arith.constant dense<0.000000e+00> : vector<2x8x8xf32>
    %81 = tpu.matmul %79, %80, %cst_30 {dimension_numbers = #tpu.dot_dimension_numbers<[2], [2], [1], [1], [0, 0, 0, 1, 1, 1], [0], [0]>} : vector<2x8x32xbf16>, vector<2x8x32xbf16>, vector<2x8x8xf32> -> vector<2x8x8xf32>
    "tpu.trace_stop"() : () -> ()
    %cst_31 = arith.constant 0.176776692 : f32
    %82 = vector.broadcast %cst_31 : f32 to vector<2x8x8xf32>
    %83 = arith.mulf %81, %82 : vector<2x8x8xf32>
    %84 = vector.broadcast %4 : vector<2x1x8xf32> to vector<2x8x8xf32>
    %85 = arith.addf %83, %84 : vector<2x8x8xf32>
    %cst_32 = arith.constant dense<0xFF800000> : vector<2x8xf32>
    %86 = vector.multi_reduction <maximumf>, %85, %cst_32 [2] : vector<2x8x8xf32> to vector<2x8xf32>
    %87 = vector.shape_cast %86 : vector<2x8xf32> to vector<2x8x1xf32>
    %88 = vector.broadcast %87 : vector<2x8x1xf32> to vector<2x8x8xf32>
    %89 = arith.subf %85, %88 : vector<2x8x8xf32>
    %90 = math.exp %89 : vector<2x8x8xf32>
    %cst_33 = arith.constant dense<0.000000e+00> : vector<2x8xf32>
    %91 = vector.multi_reduction <add>, %90, %cst_33 [2] : vector<2x8x8xf32> to vector<2x8xf32>
    %92 = vector.shape_cast %91 : vector<2x8xf32> to vector<2x8x1xf32>
    %93 = tpu.reciprocal %92 {approx = true} : vector<2x8x1xf32> -> vector<2x8x1xf32>
    %94 = vector.broadcast %93 : vector<2x8x1xf32> to vector<2x8x8xf32>
    %95 = arith.mulf %90, %94 : vector<2x8x8xf32>
    %96 = arith.truncf %95 : vector<2x8x8xf32> to vector<2x8x8xbf16>
    %97 = arith.truncf %78 : vector<2x8x32xf32> to vector<2x8x32xbf16>
    "tpu.trace_start"() <{level = 10 : i32, message = "bqk,bkd->bqd"}> : () -> ()
    %cst_34 = arith.constant dense<0.000000e+00> : vector<2x8x32xf32>
    %98 = tpu.matmul %96, %97, %cst_34 {dimension_numbers = #tpu.dot_dimension_numbers<[2], [1], [1], [2], [0, 0, 0, 1, 1, 2], [0], [0]>} : vector<2x8x8xbf16>, vector<2x8x32xbf16>, vector<2x8x32xf32> -> vector<2x8x32xf32>
    "tpu.trace_stop"() : () -> ()
    %99 = vector.shape_cast %98 : vector<2x8x32xf32> to vector<16x32xf32>
    %100 = vector.extract_strided_slice %16 {offsets = [64, 0], sizes = [32, 128], strides = [1, 1]} : vector<128x128xbf16> to vector<32x128xbf16>
    %101 = arith.truncf %99 : vector<16x32xf32> to vector<16x32xbf16>
    %cst_35 = arith.constant dense<0.000000e+00> : vector<16x128xf32>
    %102 = tpu.matmul %101, %100, %cst_35 {dimension_numbers = #tpu.dot_dimension_numbers<[1], [0], [0], [1], [0, 0, 1, 1], [], []>} : vector<16x32xbf16>, vector<32x128xbf16>, vector<16x128xf32> -> vector<16x128xf32>
    %103 = arith.addf %75, %102 : vector<16x128xf32>
    %104 = vector.extract_strided_slice %14 {offsets = [0, 0, 96], sizes = [2, 8, 32], strides = [1, 1, 1]} : vector<2x8x384xf32> to vector<2x8x32xf32>
    %105 = vector.extract_strided_slice %14 {offsets = [0, 0, 224], sizes = [2, 8, 32], strides = [1, 1, 1]} : vector<2x8x384xf32> to vector<2x8x32xf32>
    %106 = vector.extract_strided_slice %14 {offsets = [0, 0, 352], sizes = [2, 8, 32], strides = [1, 1, 1]} : vector<2x8x384xf32> to vector<2x8x32xf32>
    %107 = arith.truncf %104 : vector<2x8x32xf32> to vector<2x8x32xbf16>
    %108 = arith.truncf %105 : vector<2x8x32xf32> to vector<2x8x32xbf16>
    "tpu.trace_start"() <{level = 10 : i32, message = "bqd,bkd->bqk"}> : () -> ()
    %cst_36 = arith.constant dense<0.000000e+00> : vector<2x8x8xf32>
    %109 = tpu.matmul %107, %108, %cst_36 {dimension_numbers = #tpu.dot_dimension_numbers<[2], [2], [1], [1], [0, 0, 0, 1, 1, 1], [0], [0]>} : vector<2x8x32xbf16>, vector<2x8x32xbf16>, vector<2x8x8xf32> -> vector<2x8x8xf32>
    "tpu.trace_stop"() : () -> ()
    %cst_37 = arith.constant 0.176776692 : f32
    %110 = vector.broadcast %cst_37 : f32 to vector<2x8x8xf32>
    %111 = arith.mulf %109, %110 : vector<2x8x8xf32>
    %112 = vector.broadcast %4 : vector<2x1x8xf32> to vector<2x8x8xf32>
    %113 = arith.addf %111, %112 : vector<2x8x8xf32>
    %cst_38 = arith.constant dense<0xFF800000> : vector<2x8xf32>
    %114 = vector.multi_reduction <maximumf>, %113, %cst_38 [2] : vector<2x8x8xf32> to vector<2x8xf32>
    %115 = vector.shape_cast %114 : vector<2x8xf32> to vector<2x8x1xf32>
    %116 = vector.broadcast %115 : vector<2x8x1xf32> to vector<2x8x8xf32>
    %117 = arith.subf %113, %116 : vector<2x8x8xf32>
    %118 = math.exp %117 : vector<2x8x8xf32>
    %cst_39 = arith.constant dense<0.000000e+00> : vector<2x8xf32>
    %119 = vector.multi_reduction <add>, %118, %cst_39 [2] : vector<2x8x8xf32> to vector<2x8xf32>
    %120 = vector.shape_cast %119 : vector<2x8xf32> to vector<2x8x1xf32>
    %121 = tpu.reciprocal %120 {approx = true} : vector<2x8x1xf32> -> vector<2x8x1xf32>
    %122 = vector.broadcast %121 : vector<2x8x1xf32> to vector<2x8x8xf32>
    %123 = arith.mulf %118, %122 : vector<2x8x8xf32>
    %124 = arith.truncf %123 : vector<2x8x8xf32> to vector<2x8x8xbf16>
    %125 = arith.truncf %106 : vector<2x8x32xf32> to vector<2x8x32xbf16>
    "tpu.trace_start"() <{level = 10 : i32, message = "bqk,bkd->bqd"}> : () -> ()
    %cst_40 = arith.constant dense<0.000000e+00> : vector<2x8x32xf32>
    %126 = tpu.matmul %124, %125, %cst_40 {dimension_numbers = #tpu.dot_dimension_numbers<[2], [1], [1], [2], [0, 0, 0, 1, 1, 2], [0], [0]>} : vector<2x8x8xbf16>, vector<2x8x32xbf16>, vector<2x8x32xf32> -> vector<2x8x32xf32>
    "tpu.trace_stop"() : () -> ()
    %127 = vector.shape_cast %126 : vector<2x8x32xf32> to vector<16x32xf32>
    %128 = vector.extract_strided_slice %16 {offsets = [96, 0], sizes = [32, 128], strides = [1, 1]} : vector<128x128xbf16> to vector<32x128xbf16>
    %129 = arith.truncf %127 : vector<16x32xf32> to vector<16x32xbf16>
    %cst_41 = arith.constant dense<0.000000e+00> : vector<16x128xf32>
    %130 = tpu.matmul %129, %128, %cst_41 {dimension_numbers = #tpu.dot_dimension_numbers<[1], [0], [0], [1], [0, 0, 1, 1], [], []>} : vector<16x32xbf16>, vector<32x128xbf16>, vector<16x128xf32> -> vector<16x128xf32>
    %131 = arith.addf %103, %130 : vector<16x128xf32>
    %132 = arith.addf %5, %131 : vector<16x128xf32>
    %c0_42 = arith.constant 0 : index
    %c0_43 = arith.constant 0 : index
    %c0_44 = arith.constant 0 : index
    %133 = vector.load %arg9[%c0_42, %c0_43, %c0_44] : memref<1x1x128xf32, #tpu.memory_space<vmem>>, vector<1x1x128xf32>
    %134 = vector.shape_cast %133 : vector<1x1x128xf32> to vector<1x128xf32>
    %c0_45 = arith.constant 0 : index
    %c0_46 = arith.constant 0 : index
    %c0_47 = arith.constant 0 : index
    %135 = vector.load %arg10[%c0_45, %c0_46, %c0_47] : memref<1x1x128xf32, #tpu.memory_space<vmem>>, vector<1x1x128xf32>
    %136 = vector.shape_cast %135 : vector<1x1x128xf32> to vector<1x128xf32>
    %cst_48 = arith.constant dense<0.000000e+00> : vector<16xf32>
    %137 = vector.multi_reduction <add>, %132, %cst_48 [1] : vector<16x128xf32> to vector<16xf32>
    %138 = vector.shape_cast %137 : vector<16xf32> to vector<16x1xf32>
    %cst_49 = arith.constant 1.280000e+02 : f32
    %139 = vector.broadcast %cst_49 : f32 to vector<16x1xf32>
    %140 = arith.divf %138, %139 : vector<16x1xf32>
    %141 = vector.broadcast %140 : vector<16x1xf32> to vector<16x128xf32>
    %142 = arith.subf %132, %141 : vector<16x128xf32>
    %143 = arith.mulf %142, %142 : vector<16x128xf32>
    %cst_50 = arith.constant dense<0.000000e+00> : vector<16xf32>
    %144 = vector.multi_reduction <add>, %143, %cst_50 [1] : vector<16x128xf32> to vector<16xf32>
    %145 = vector.shape_cast %144 : vector<16xf32> to vector<16x1xf32>
    %cst_51 = arith.constant 1.280000e+02 : f32
    %146 = vector.broadcast %cst_51 : f32 to vector<16x1xf32>
    %147 = arith.divf %145, %146 : vector<16x1xf32>
    %cst_52 = arith.constant 9.99999996E-13 : f32
    %148 = vector.broadcast %cst_52 : f32 to vector<16x1xf32>
    %149 = arith.addf %147, %148 : vector<16x1xf32>
    %150 = math.rsqrt %149 : vector<16x1xf32>
    %151 = vector.broadcast %150 : vector<16x1xf32> to vector<16x128xf32>
    %152 = arith.mulf %142, %151 : vector<16x128xf32>
    %153 = vector.broadcast %134 : vector<1x128xf32> to vector<16x128xf32>
    %154 = arith.mulf %152, %153 : vector<16x128xf32>
    %155 = vector.broadcast %136 : vector<1x128xf32> to vector<16x128xf32>
    %156 = arith.addf %154, %155 : vector<16x128xf32>
    %c0_53 = arith.constant 0 : index
    %c0_54 = arith.constant 0 : index
    %c0_55 = arith.constant 0 : index
    %157 = vector.load %arg11[%c0_53, %c0_54, %c0_55] : memref<1x128x512xbf16, #tpu.memory_space<vmem>>, vector<1x128x512xbf16>
    %158 = vector.shape_cast %157 : vector<1x128x512xbf16> to vector<128x512xbf16>
    %159 = arith.truncf %156 : vector<16x128xf32> to vector<16x128xbf16>
    %cst_56 = arith.constant dense<0.000000e+00> : vector<16x512xf32>
    %160 = tpu.matmul %159, %158, %cst_56 {dimension_numbers = #tpu.dot_dimension_numbers<[1], [0], [0], [1], [0, 0, 1, 1], [], []>} : vector<16x128xbf16>, vector<128x512xbf16>, vector<16x512xf32> -> vector<16x512xf32>
    %c0_57 = arith.constant 0 : index
    %c0_58 = arith.constant 0 : index
    %c0_59 = arith.constant 0 : index
    %161 = vector.load %arg12[%c0_57, %c0_58, %c0_59] : memref<1x1x512xf32, #tpu.memory_space<vmem>>, vector<1x1x512xf32>
    %162 = vector.shape_cast %161 : vector<1x1x512xf32> to vector<1x512xf32>
    %163 = vector.broadcast %162 : vector<1x512xf32> to vector<16x512xf32>
    %164 = arith.addf %160, %163 : vector<16x512xf32>
    %cst_60 = arith.constant 5.000000e-01 : f32
    %165 = vector.broadcast %cst_60 : f32 to vector<16x512xf32>
    %166 = arith.mulf %164, %165 : vector<16x512xf32>
    %cst_61 = arith.constant 0.707106769 : f32
    %167 = vector.broadcast %cst_61 : f32 to vector<16x512xf32>
    %168 = arith.mulf %164, %167 : vector<16x512xf32>
    %169 = math.erf %168 : vector<16x512xf32>
    %cst_62 = arith.constant 1.000000e+00 : f32
    %170 = vector.broadcast %cst_62 : f32 to vector<16x512xf32>
    %171 = arith.addf %170, %169 : vector<16x512xf32>
    %172 = arith.mulf %166, %171 : vector<16x512xf32>
    %c0_63 = arith.constant 0 : index
    %c0_64 = arith.constant 0 : index
    %c0_65 = arith.constant 0 : index
    %173 = vector.load %arg13[%c0_63, %c0_64, %c0_65] : memref<1x512x128xbf16, #tpu.memory_space<vmem>>, vector<1x512x128xbf16>
    %174 = vector.shape_cast %173 : vector<1x512x128xbf16> to vector<512x128xbf16>
    %175 = arith.truncf %172 : vector<16x512xf32> to vector<16x512xbf16>
    %cst_66 = arith.constant dense<0.000000e+00> : vector<16x128xf32>
    %176 = tpu.matmul %175, %174, %cst_66 {dimension_numbers = #tpu.dot_dimension_numbers<[1], [0], [0], [1], [0, 0, 1, 1], [], []>} : vector<16x512xbf16>, vector<512x128xbf16>, vector<16x128xf32> -> vector<16x128xf32>
    %c0_67 = arith.constant 0 : index
    %c0_68 = arith.constant 0 : index
    %c0_69 = arith.constant 0 : index
    %177 = vector.load %arg14[%c0_67, %c0_68, %c0_69] : memref<1x1x128xf32, #tpu.memory_space<vmem>>, vector<1x1x128xf32>
    %178 = vector.shape_cast %177 : vector<1x1x128xf32> to vector<1x128xf32>
    %179 = vector.broadcast %178 : vector<1x128xf32> to vector<16x128xf32>
    %180 = arith.addf %176, %179 : vector<16x128xf32>
    %181 = arith.addf %156, %180 : vector<16x128xf32>
    %c0_70 = arith.constant 0 : index
    %c0_71 = arith.constant 0 : index
    %c0_72 = arith.constant 0 : index
    %182 = vector.load %arg15[%c0_70, %c0_71, %c0_72] : memref<1x1x128xf32, #tpu.memory_space<vmem>>, vector<1x1x128xf32>
    %183 = vector.shape_cast %182 : vector<1x1x128xf32> to vector<1x128xf32>
    %c0_73 = arith.constant 0 : index
    %c0_74 = arith.constant 0 : index
    %c0_75 = arith.constant 0 : index
    %184 = vector.load %arg16[%c0_73, %c0_74, %c0_75] : memref<1x1x128xf32, #tpu.memory_space<vmem>>, vector<1x1x128xf32>
    %185 = vector.shape_cast %184 : vector<1x1x128xf32> to vector<1x128xf32>
    %cst_76 = arith.constant dense<0.000000e+00> : vector<16xf32>
    %186 = vector.multi_reduction <add>, %181, %cst_76 [1] : vector<16x128xf32> to vector<16xf32>
    %187 = vector.shape_cast %186 : vector<16xf32> to vector<16x1xf32>
    %cst_77 = arith.constant 1.280000e+02 : f32
    %188 = vector.broadcast %cst_77 : f32 to vector<16x1xf32>
    %189 = arith.divf %187, %188 : vector<16x1xf32>
    %190 = vector.broadcast %189 : vector<16x1xf32> to vector<16x128xf32>
    %191 = arith.subf %181, %190 : vector<16x128xf32>
    %192 = arith.mulf %191, %191 : vector<16x128xf32>
    %cst_78 = arith.constant dense<0.000000e+00> : vector<16xf32>
    %193 = vector.multi_reduction <add>, %192, %cst_78 [1] : vector<16x128xf32> to vector<16xf32>
    %194 = vector.shape_cast %193 : vector<16xf32> to vector<16x1xf32>
    %cst_79 = arith.constant 1.280000e+02 : f32
    %195 = vector.broadcast %cst_79 : f32 to vector<16x1xf32>
    %196 = arith.divf %194, %195 : vector<16x1xf32>
    %cst_80 = arith.constant 9.99999996E-13 : f32
    %197 = vector.broadcast %cst_80 : f32 to vector<16x1xf32>
    %198 = arith.addf %196, %197 : vector<16x1xf32>
    %199 = math.rsqrt %198 : vector<16x1xf32>
    %200 = vector.broadcast %199 : vector<16x1xf32> to vector<16x128xf32>
    %201 = arith.mulf %191, %200 : vector<16x128xf32>
    %202 = vector.broadcast %183 : vector<1x128xf32> to vector<16x128xf32>
    %203 = arith.mulf %201, %202 : vector<16x128xf32>
    %204 = vector.broadcast %185 : vector<1x128xf32> to vector<16x128xf32>
    %205 = arith.addf %203, %204 : vector<16x128xf32>
    %206 = vector.shape_cast %205 : vector<16x128xf32> to vector<2x8x128xf32>
    %c0_81 = arith.constant 0 : index
    %c0_82 = arith.constant 0 : index
    %c0_83 = arith.constant 0 : index
    %207 = vector.load %arg19[%c0_81, %c0_82, %c0_83] : memref<2x8x128xf32, #tpu.memory_space<vmem>>, vector<2x8x128xf32>
    tpu.vector_store %arg19[%c0_81, %c0_82, %c0_83], %206 {strides = array<i32>} : memref<2x8x128xf32, #tpu.memory_space<vmem>>, vector<2x8x128xf32>,
    %c1_i32 = arith.constant 1 : i32
    %208 = arith.cmpi eq, %arg0, %c1_i32 : i32
    %209 = arith.extui %208 : i1 to i32
    %c0_i32_84 = arith.constant 0 : i32
    %210 = arith.cmpi ne, %209, %c0_i32_84 : i32
    scf.if %210 {
      %211 = vector.shape_cast %205 : vector<16x128xf32> to vector<2x8x128xf32>
      %212 = vector.extract_strided_slice %211 {offsets = [0, 0, 0], sizes = [2, 1, 128], strides = [1, 1, 1]} : vector<2x8x128xf32> to vector<2x1x128xf32>
      %213 = vector.shape_cast %212 : vector<2x1x128xf32> to vector<2x128xf32>
      %c0_85 = arith.constant 0 : index
      %c0_86 = arith.constant 0 : index
      %214 = vector.load %arg17[%c0_85, %c0_86] : memref<128x128xbf16, #tpu.memory_space<vmem>>, vector<128x128xbf16>
      %215 = arith.truncf %213 : vector<2x128xf32> to vector<2x128xbf16>
      %cst_87 = arith.constant dense<0.000000e+00> : vector<2x128xf32>
      %216 = tpu.matmul %215, %214, %cst_87 {dimension_numbers = #tpu.dot_dimension_numbers<[1], [0], [0], [1], [0, 0, 1, 1], [], []>} : vector<2x128xbf16>, vector<128x128xbf16>, vector<2x128xf32> -> vector<2x128xf32>
      %c0_88 = arith.constant 0 : index
      %c0_89 = arith.constant 0 : index
      %217 = vector.load %arg18[%c0_88, %c0_89] : memref<1x128xf32, #tpu.memory_space<vmem>>, vector<1x128xf32>
      %218 = vector.broadcast %217 : vector<1x128xf32> to vector<2x128xf32>
      %219 = arith.addf %216, %218 : vector<2x128xf32>
      %220 = math.tanh %219 : vector<2x128xf32>
      %221 = vector.shape_cast %220 : vector<2x128xf32> to vector<2x1x128xf32>
      %c0_90 = arith.constant 0 : index
      %c0_91 = arith.constant 0 : index
      %c0_92 = arith.constant 0 : index
      %222 = vector.load %arg20[%c0_90, %c0_91, %c0_92] : memref<2x1x128xf32, #tpu.memory_space<vmem>>, vector<2x1x128xf32>
      tpu.vector_store %arg20[%c0_90, %c0_91, %c0_92], %221 {strides = array<i32>} : memref<2x1x128xf32, #tpu.memory_space<vmem>>, vector<2x1x128xf32>,
    } else {
    }
    return
  }
  func.func @transform_0(%arg0: i32) -> (i32, i32, i32) {
    %c0_i32 = arith.constant 0 : i32
    %c0_i32_0 = arith.constant 0 : i32
    %c0_i32_1 = arith.constant 0 : i32
    %c0_i32_2 = arith.constant 0 : i32
    return %c0_i32, %c0_i32_0, %c0_i32_1 : i32, i32, i32
  }
  func.func @transform_1(%arg0: i32) -> (i32, i32, i32) {
    %c0_i32 = arith.constant 0 : i32
    %c0_i32_0 = arith.constant 0 : i32
    %c0_i32_1 = arith.constant 0 : i32
    %c0_i32_2 = arith.constant 0 : i32
    return %c0_i32, %c0_i32_0, %c0_i32_1 : i32, i32, i32
  }
  func.func @transform_2(%arg0: i32) -> (i32, i32) {
    %c0_i32 = arith.constant 0 : i32
    %c0_i32_0 = arith.constant 0 : i32
    %c0_i32_1 = arith.constant 0 : i32
    return %c0_i32, %c0_i32_0 : i32, i32
  }
  func.func @transform_3(%arg0: i32) -> (i32, i32) {
    %c0_i32 = arith.constant 0 : i32
    %c0_i32_0 = arith.constant 0 : i32
    %c0_i32_1 = arith.constant 0 : i32
    return %c0_i32, %c0_i32_0 : i32, i32
  }
  func.func @transform_4(%arg0: i32) -> (i32, i32, i32) {
    %c0_i32 = arith.constant 0 : i32
    %c0_i32_0 = arith.constant 0 : i32
    %c0_i32_1 = arith.constant 0 : i32
    return %arg0, %c0_i32, %c0_i32_0 : i32, i32, i32
  }
  func.func @transform_5(%arg0: i32) -> (i32, i32, i32) {
    %c0_i32 = arith.constant 0 : i32
    %c0_i32_0 = arith.constant 0 : i32
    %c0_i32_1 = arith.constant 0 : i32
    return %arg0, %c0_i32, %c0_i32_0 : i32, i32, i32
  }
  func.func @transform_6(%arg0: i32) -> (i32, i32, i32) {
    %c0_i32 = arith.constant 0 : i32
    %c0_i32_0 = arith.constant 0 : i32
    %c0_i32_1 = arith.constant 0 : i32
    return %arg0, %c0_i32, %c0_i32_0 : i32, i32, i32
  }
  func.func @transform_7(%arg0: i32) -> (i32, i32, i32) {
    %c0_i32 = arith.constant 0 : i32
    %c0_i32_0 = arith.constant 0 : i32
    %c0_i32_1 = arith.constant 0 : i32
    return %arg0, %c0_i32, %c0_i32_0 : i32, i32, i32
  }
  func.func @transform_8(%arg0: i32) -> (i32, i32, i32) {
    %c0_i32 = arith.constant 0 : i32
    %c0_i32_0 = arith.constant 0 : i32
    %c0_i32_1 = arith.constant 0 : i32
    return %arg0, %c0_i32, %c0_i32_0 : i32, i32, i32
  }
  func.func @transform_9(%arg0: i32) -> (i32, i32, i32) {
    %c0_i32 = arith.constant 0 : i32
    %c0_i32_0 = arith.constant 0 : i32
    %c0_i32_1 = arith.constant 0 : i32
    return %arg0, %c0_i32, %c0_i32_0 : i32, i32, i32
  }
  func.func @transform_10(%arg0: i32) -> (i32, i32, i32) {
    %c0_i32 = arith.constant 0 : i32
    %c0_i32_0 = arith.constant 0 : i32
    %c0_i32_1 = arith.constant 0 : i32
    return %arg0, %c0_i32, %c0_i32_0 : i32, i32, i32
  }
  func.func @transform_11(%arg0: i32) -> (i32, i32, i32) {
    %c0_i32 = arith.constant 0 : i32
    %c0_i32_0 = arith.constant 0 : i32
    %c0_i32_1 = arith.constant 0 : i32
    return %arg0, %c0_i32, %c0_i32_0 : i32, i32, i32
  }
  func.func @transform_12(%arg0: i32) -> (i32, i32, i32) {
    %c0_i32 = arith.constant 0 : i32
    %c0_i32_0 = arith.constant 0 : i32
    %c0_i32_1 = arith.constant 0 : i32
    return %arg0, %c0_i32, %c0_i32_0 : i32, i32, i32
  }
  func.func @transform_13(%arg0: i32) -> (i32, i32, i32) {
    %c0_i32 = arith.constant 0 : i32
    %c0_i32_0 = arith.constant 0 : i32
    %c0_i32_1 = arith.constant 0 : i32
    return %arg0, %c0_i32, %c0_i32_0 : i32, i32, i32
  }
  func.func @transform_14(%arg0: i32) -> (i32, i32, i32) {
    %c0_i32 = arith.constant 0 : i32
    %c0_i32_0 = arith.constant 0 : i32
    %c0_i32_1 = arith.constant 0 : i32
    return %arg0, %c0_i32, %c0_i32_0 : i32, i32, i32
  }
  func.func @transform_15(%arg0: i32) -> (i32, i32, i32) {
    %c0_i32 = arith.constant 0 : i32
    %c0_i32_0 = arith.constant 0 : i32
    %c0_i32_1 = arith.constant 0 : i32
    return %arg0, %c0_i32, %c0_i32_0 : i32, i32, i32
  }
  func.func @transform_16(%arg0: i32) -> (i32, i32) {
    %c0_i32 = arith.constant 0 : i32
    %c0_i32_0 = arith.constant 0 : i32
    %c0_i32_1 = arith.constant 0 : i32
    return %c0_i32, %c0_i32_0 : i32, i32
  }
  func.func @transform_17(%arg0: i32) -> (i32, i32) {
    %c0_i32 = arith.constant 0 : i32
    %c0_i32_0 = arith.constant 0 : i32
    %c0_i32_1 = arith.constant 0 : i32
    return %c0_i32, %c0_i32_0 : i32, i32
  }
  func.func @transform_18(%arg0: i32) -> (i32, i32, i32) {
    %c0_i32 = arith.constant 0 : i32
    %c0_i32_0 = arith.constant 0 : i32
    %c0_i32_1 = arith.constant 0 : i32
    %c0_i32_2 = arith.constant 0 : i32
    return %c0_i32, %c0_i32_0, %c0_i32_1 : i32, i32, i32
  }
  func.func @transform_19(%arg0: i32) -> (i32, i32, i32) {
    %c0_i32 = arith.constant 0 : i32
    %c0_i32_0 = arith.constant 0 : i32
    %c0_i32_1 = arith.constant 0 : i32
    %c0_i32_2 = arith.constant 0 : i32
    return %c0_i32, %c0_i32_0, %c0_i32_1 : i32, i32, i32
  }
}

</mosaic_0001>

<bundles_post_ra>
// kernel: bert_forward.1
= control target key start
LH: loop header
LB: loop body
LE: loop exit
PB: predicated region body
PF: predicated region fallthrough
CT: control target
= control target key end

     0   :  { %s4715_s0 = inlined_call_operand.vmem [shape: f32[2,8,128], index: 0, kind: input, shape index: {}]   ;;  %s4716_s1 = inlined_call_operand.vmem [shape: f32[2,1,8], index: 1, kind: input, shape index: {}]   ;;  %s4717_s2 = inlined_call_operand.vmem [shape: f32[1,128], index: 2, kind: input, shape index: {}]   ;;  %s4718_s3 = inlined_call_operand.vmem [shape: f32[1,128], index: 3, kind: input, shape index: {}]   ;;  %s4719_s4 = inlined_call_operand.vmem [shape: bf16[2,128,384], index: 4, kind: input, shape index: {}]   ;;  %s4720_s5 = inlined_call_operand.vmem [shape: f32[2,1,384], index: 5, kind: input, shape index: {}]   ;;  %s4721_s6 = inlined_call_operand.vmem [shape: bf16[2,128,128], index: 6, kind: input, shape index: {}]   ;;  %s4722_s7 = inlined_call_operand.vmem [shape: f32[2,1,128], index: 7, kind: input, shape index: {}]   ;;  %s4723_s8 = inlined_call_operand.vmem [shape: f32[2,1,128], index: 8, kind: input, shape index: {}]   ;;  %s4724_s9 = inlined_call_operand.vmem [shape: f32[2,1,128], index: 9, kind: input, shape index: {}]   ;;  %s4725_s10 = inlined_call_operand.vmem [shape: bf16[2,128,512], index: 10, kind: input, shape index: {}]   ;;  %s4726_s11 = inlined_call_operand.vmem [shape: f32[2,1,512], index: 11, kind: input, shape index: {}]   ;;  %s4727_s12 = inlined_call_operand.vmem [shape: bf16[2,512,128], index: 12, kind: input, shape index: {}]   ;;  %s4728_s13 = inlined_call_operand.vmem [shape: f32[2,1,128], index: 13, kind: input, shape index: {}]   ;;  %s4729_s14 = inlined_call_operand.vmem [shape: f32[2,1,128], index: 14, kind: input, shape index: {}]   ;;  %s4730_s15 = inlined_call_operand.vmem [shape: f32[2,1,128], index: 15, kind: input, shape index: {}]   ;;  %s4731_s16 = inlined_call_operand.vmem [shape: bf16[128,128], index: 16, kind: input, shape index: {}]   ;;  %s4732_s17 = inlined_call_operand.vmem [shape: f32[1,128], index: 17, kind: input, shape index: {}]   ;;  %s4733_s18 = inlined_call_operand.hbm [shape: f32[2,8,128], index: 18, kind: output, shape index: {0}]   ;;  %s4734_s19 = inlined_call_operand.hbm [shape: f32[2,1,128], index: 19, kind: output, shape index: {1}]  }
   0x1   :  { %4739 = sst [smem:[#allocation9_spill]] %s4715_s0 }
   0x2   :  { %4740 = sst [smem:[#allocation10_spill]] %s4716_s1 }
   0x3   :  { %4741 = sst [smem:[#allocation11_spill]] %s4717_s2 }
   0x4   :  { %4742 = sst [smem:[#allocation12_spill]] %s4718_s3 }
   0x5   :  { %4743 = sst [smem:[#allocation13_spill]] %s4719_s4 }
   0x6   :  { %4744 = sst [smem:[#allocation14_spill]] %s4720_s5 }
   0x7   :  { %4745 = sst [smem:[#allocation15_spill]] %s4721_s6 }
   0x8   :  { %4746 = sst [smem:[#allocation16_spill]] %s4725_s10 }
   0x9   :  { %4747 = sst [smem:[#allocation17_spill]] %s4731_s16 }
   0xa   :  { %4748 = sst [smem:[#allocation18_spill]] %s4732_s17 }
   0xb   :  { %4749 = sst [smem:[#allocation19_spill]] %s4733_s18 }
   0xc   :  { %4750 = sst [smem:[#allocation20_spill]] %s4734_s19 }
   0xd   :  { %25 = vsyncpa [#allocation3], 0 }
   0xe   :  { %26 = vsyncpa [#allocation5], 0  ;;  %s3886_s0 = smov 0  }
   0xf LB: > { %4751 = sst [smem:[#allocation8_spill]] %s3773_s0  ;;  %s3892_s30 = sadd.s32 4294967295, %s3773_s0   ;;  %s3773_s0 = sphi %s3886_s0, %s32_s0  }
  0x10   : > { %p3025_p0 = scmp.ge.s32.totalorder %s3773_s0, 1  ;;  %p628_p1 = scmp.lt.s32.totalorder %s3773_s0, 3 }
  0x12   : > { %p629_p2 = pnand %p3025_p0, %p628_p1 }
  0x13   : > { %p720_p3 = scmp.lt.s32.totalorder (!%p629_p2), %s3892_s30, 1  ;;  %s4752_s6 = sld [smem:[#allocation15_spill]] (!%p629_p2) }
  0x14   : > { %632 = sbr.rel (%p629_p2) target bundleno = 3088 (0xc10), region = 92  ;;  %s4753_s4 = sld [smem:[#allocation13_spill]] (!%p629_p2) }
  0x15   : > { %s4754_s5 = sld [smem:[#allocation14_spill]] (!%p629_p2)  ;;  %p3034_p4 = scmp.ne.s32.totalorder (!%p629_p2), %s3892_s30, 0 }
  0x16   : > { %s4755_s10 = sld [smem:[#allocation16_spill]] (!%p629_p2) }
  0x19   : > { %s3898_s20 = scalar_select %p720_p3, %s3892_s30, 1 }
  0x1a   : > { %s4756_s28 = sld [smem:[#allocation9_spill]] (!%p3034_p4) }
  0x1b   : > { %s3593_s21 = smul.u32 192, %s3898_s20  ;;  %s3486_s1 = sshll.u32 %s3898_s20, 6 }
  0x1c   : > { %s3594_s22 = smul.u32 3, %s3898_s20  ;;  %s3906_s24 = scalar_lea.vmem %s4752_s6, %s3486_s1 }
  0x1d   : > { %s3911_s26 = scalar_lea.vmem %s4753_s4, %s3593_s21  ;;  %s3487_s25 = sshll.u32 %s3898_s20, 8 }
  0x1e   : > { %s3920_s18 = scalar_lea.vmem %s4754_s5, %s3594_s22  ;;  %s3934_s4 = scalar_lea.vmem %s4755_s10, %s3487_s25 }
  0x1f   : > { %s3031_s27 = sshll.u32 %s3898_s20, 2  ;;  %s3945_s16 = scalar_lea.vmem %s4727_s12, %s3487_s25 }
  0x20   : > { %s3940_s19 = scalar_lea.vmem %s4726_s11, %s3031_s27  ;;  %s759_s23 = scalar_lea.vmem %s4728_s13, %s3898_s20 }
  0x21   : > { %s762_s21 = scalar_lea.vmem %s4729_s14, %s3898_s20  ;;  %s765_s10 = scalar_lea.vmem %s4730_s15, %s3898_s20 }
  0x22   : > { %770 = sbr.rel (%p3034_p4) target bundleno = 315 (0x13b), region = 96  ;;  %s4757_s2 = sld [smem:[#allocation11_spill]] (!%p3034_p4) }
  0x23   : > { %s4758_s1 = sld [smem:[#allocation12_spill]] (!%p3034_p4) }
  0x27   : > { %v771_v0 = vld [vmem:[%s4756_s28] sm:$0xff]  ;;  %v772_v1 = vld [vmem:[%s4756_s28 + $0x8] sm:$0xff]  ;;  %v3775_v2 = vmov 128.0  }
  0x28   : > { %775 = vadd.xlane.f32.xlu0 %v771_v0  ;;  %3628 = vrcp.f32 %v3775_v2  ;;  %v3626_v31 = vld [vmem:[%s4757_s2] ss:$0 sm:$0xff] }
  0x29   : > { %v3627_v34 = vld [vmem:[%s4758_s1] ss:$0 sm:$0xff] }
  0x2e   : > { %v3629_v3 = vpop.eup %3628 }
  0x2f   : > { %v780_v4 = vmul.f32 128.0, %v3629_v3  ;;  %vm784_vm0 = vweird.f32 %v3629_v3 }
  0x30   : > { %777 = vadd.xlane.f32.xlu0 %v772_v1 }
  0x31   : > { %v781_v5 = vsub.f32 1.0, %v780_v4 }
  0x33   : > { %v782_v6 = vmul.f32 %v3629_v3, %v781_v5 }
  0x35   : > { %v783_v7 = vadd.f32 %v3629_v3, %v782_v6 }
  0x37   : > { %v785_v8 = vsel %vm784_vm0, %v3629_v3, %v783_v7 }
  0x9b   : > { %v776_v9 = vpop.xlane.xlu0 %775 }
  0x9c   : > { %v786_v10 = vmul.f32 %v785_v8, %v776_v9 }
  0x9e   : > { %v788_v11 = vsub.f32 %v771_v0, %v786_v10 }
  0xa0   : > { %v790_v12 = vmul.f32 %v788_v11, %v788_v11 }
  0xa2   : > { %792 = vadd.xlane.f32.xlu1 %v790_v12 }
  0xa3   : > { %v778_v13 = vpop.xlane.xlu0 %777 }
  0xa4   : > { %v787_v14 = vmul.f32 %v785_v8, %v778_v13 }
  0xa6   : > { %v789_v15 = vsub.f32 %v772_v1, %v787_v14 }
  0xa8   : > { %v791_v16 = vmul.f32 %v789_v15, %v789_v15 }
  0xaa   : > { %794 = vadd.xlane.f32.xlu1 %v791_v16 }
 0x115   : > { %v793_v17 = vpop.xlane.xlu1 %792 }
 0x116   : > { %v796_v18 = vmul.f32 %v793_v17, %v785_v8 }
 0x118   : > { %v798_v19 = vadd.f32 1e-12, %v796_v18 }
 0x11a   : > { %3630 = vrsqrt.f32 %v798_v19  ;;  %vm806_vm2 = vweird.f32 %v798_v19 }
 0x11d   : > { %v795_v20 = vpop.xlane.xlu1 %794 }
 0x11e   : > { %v797_v21 = vmul.f32 %v795_v20, %v785_v8 }
 0x120   : > { %v3631_v22 = vpop.eup %3630  ;;  %v799_v23 = vadd.f32 1e-12, %v797_v21 }
 0x121   : > { %v801_v24 = vmul.f32 %v3631_v22, %v798_v19  ;;  %vm807_vm1 = vweird.f32 %v3631_v22 }
 0x122   : > { %3632 = vrsqrt.f32 %v799_v23  ;;  %vm808_vm3 = vmor %vm806_vm2, %vm807_vm1  ;;  %vm816_vm5 = vweird.f32 %v799_v23 }
 0x123   : > { %v802_v25 = vmul.f32 %v3631_v22, %v801_v24 }
 0x125   : > { %v803_v26 = vmul.f32 0.5, %v802_v25 }
 0x127   : > { %v804_v27 = vsub.f32 1.5, %v803_v26 }
 0x128   : > { %v3633_v28 = vpop.eup %3632 }
 0x129   : > { %v805_v29 = vmul.f32 %v3631_v22, %v804_v27  ;;  %v811_v30 = vmul.f32 %v3633_v28, %v799_v23  ;;  %vm817_vm4 = vweird.f32 %v3633_v28 }
 0x12a   : > { %vm818_vm6 = vmor %vm816_vm5, %vm817_vm4 }
 0x12b   : > { %v809_v32 = vsel %vm808_vm3, %v3631_v22, %v805_v29  ;;  %v812_v33 = vmul.f32 %v3633_v28, %v811_v30 }
 0x12c   : > { %v820_v35 = vmul.f32 %v809_v32, %v788_v11 }
 0x12d   : > { %v813_v36 = vmul.f32 0.5, %v812_v33 }
 0x12e   : > { %v825_v37 = vmul.f32 %v3626_v31, %v820_v35 }
 0x12f   : > { %v814_v38 = vsub.f32 1.5, %v813_v36 }
 0x130   : > { %v830_v39 = vadd.f32 %v3627_v34, %v825_v37 }
 0x131   : > { %v815_v40 = vmul.f32 %v3633_v28, %v814_v38 }
 0x132   : > { %832 = vst [vmem:[#allocation2] sm:$0xff] %v830_v39 }
 0x133   : > { %v819_v41 = vsel %vm818_vm6, %v3633_v28, %v815_v40 }
 0x134   : > { %v821_v42 = vmul.f32 %v819_v41, %v789_v15 }
 0x136   : > { %v826_v43 = vmul.f32 %v3626_v31, %v821_v42 }
 0x138   : > { %v831_v44 = vadd.f32 %v3627_v34, %v826_v43 }
 0x13a   : > { %833 = vst [vmem:[#allocation2 + $0x8] sm:$0xff] %v831_v44 }
 0x13b PF: > { %v3121_v45 = vld [vmem:[%s3911_s26 + $0xa8] sm:$0xf]  ;;  %v3511_v46 = vld [vmem:[%s3911_s26 + $0xb0] sm:$0xf0]  ;;  %v3510_v47 = vld [vmem:[%s3911_s26 + $0xac] sm:$0xf]  ;;  %s4760_s22 = scalar_lea.vmem %s4722_s7, %s3898_s20  ;;  %s4761_s17 = scalar_lea.vmem %s4723_s8, %s3898_s20 }
 0x13c   : > { %v3122_v48 = vor.u32 %v3511_v46, %v3121_v45  ;;  %v3123_v49 = vld [vmem:[%s3911_s26 + $0xb4] sm:$0xf0]  ;;  %v3109_v50 = vld [vmem:[%s3911_s26 + $0x90] sm:$0xf]  ;;  %v3508_v51 = vld [vmem:[%s3911_s26 + $0x98] sm:$0xf0] }
 0x13d   : > { %v3126_v52 = vor.u32 %v3510_v47, %v3123_v49  ;;  %v3507_v53 = vld [vmem:[%s3911_s26 + $0x94] sm:$0xf]  ;;  %v3111_v54 = vld [vmem:[%s3911_s26 + $0x9c] sm:$0xf0]  ;;  %v3110_v55 = vor.u32 %v3508_v51, %v3109_v50  ;;  %v3097_v57 = vld [vmem:[%s3911_s26 + $0x78] sm:$0xf] }
 0x13e   : > { %1007 = vmatpush.bf16.msra.mxu0 %v3122_v48  ;;  %v3114_v56 = vor.u32 %v3507_v53, %v3111_v54  ;;  %v3505_v58 = vld [vmem:[%s3911_s26 + $0x80] sm:$0xf0]  ;;  %v3504_v59 = vld [vmem:[%s3911_s26 + $0x7c] sm:$0xf]  ;;  %v3099_v60 = vld [vmem:[%s3911_s26 + $0x84] sm:$0xf0] }
 0x13f   : > { %1021 = vmatpush.bf16.msra.mxu1 %v3126_v52  ;;  %v3098_v61 = vor.u32 %v3505_v58, %v3097_v57  ;;  %v3102_v62 = vor.u32 %v3504_v59, %v3099_v60  ;;  %v3085_v63 = vld [vmem:[%s3911_s26 + $0x60] sm:$0xf]  ;;  %v3502_v0 = vld [vmem:[%s3911_s26 + $0x68] sm:$0xf0]  ;;  %v3501_v1 = vld [vmem:[%s3911_s26 + $0x64] sm:$0xf] }
 0x140   : > { %v3087_v2 = vld [vmem:[%s3911_s26 + $0x6c] sm:$0xf0]  ;;  %v3086_v3 = vor.u32 %v3502_v0, %v3085_v63  ;;  %v3073_v4 = vld [vmem:[%s3911_s26 + $0x48] sm:$0xf]  ;;  %v3512_v6 = vld [vmem:[%s3911_s26 + $0xb8] sm:$0xf0] }
 0x141   : > { %v3129_v5 = vld [vmem:[%s3911_s26 + $0xb0] sm:$0xf]  ;;  %v3090_v7 = vor.u32 %v3501_v1, %v3087_v2  ;;  %v3499_v8 = vld [vmem:[%s3911_s26 + $0x50] sm:$0xf0]  ;;  %v3117_v10 = vld [vmem:[%s3911_s26 + $0x98] sm:$0xf] }
 0x142   : > { %1008 = vmatpush.bf16.msra.mxu0 %v3110_v55  ;;  %v3130_v9 = vor.u32 %v3512_v6, %v3129_v5  ;;  %v3509_v11 = vld [vmem:[%s3911_s26 + $0xa0] sm:$0xf0]  ;;  %v3498_v12 = vld [vmem:[%s3911_s26 + $0x4c] sm:$0xf]  ;;  %v3075_v13 = vld [vmem:[%s3911_s26 + $0x54] sm:$0xf0]  ;;  %v3074_v15 = vor.u32 %v3499_v8, %v3073_v4 }
 0x143   : > { %1022 = vmatpush.bf16.msra.mxu1 %v3114_v56  ;;  %v3118_v14 = vor.u32 %v3509_v11, %v3117_v10  ;;  %v3061_v16 = vld [vmem:[%s3911_s26 + $0x30] sm:$0xf]  ;;  %v3105_v17 = vld [vmem:[%s3911_s26 + $0x80] sm:$0xf]  ;;  %v3506_v18 = vld [vmem:[%s3911_s26 + $0x88] sm:$0xf0]  ;;  %v3078_v19 = vor.u32 %v3498_v12, %v3075_v13 }
 0x144   : > { %1035 = vmatpush.bf16.msra.mxu2 %v3130_v9  ;;  %v3496_v20 = vld [vmem:[%s3911_s26 + $0x38] sm:$0xf0]  ;;  %v3495_v21 = vld [vmem:[%s3911_s26 + $0x34] sm:$0xf]  ;;  %v3063_v22 = vld [vmem:[%s3911_s26 + $0x3c] sm:$0xf0]  ;;  %v3106_v25 = vor.u32 %v3506_v18, %v3105_v17 }
 0x145   : > { %v3093_v23 = vld [vmem:[%s3911_s26 + $0x68] sm:$0xf]  ;;  %v3503_v24 = vld [vmem:[%s3911_s26 + $0x70] sm:$0xf0]  ;;  %v3062_v26 = vor.u32 %v3496_v20, %v3061_v16  ;;  %v3066_v27 = vor.u32 %v3495_v21, %v3063_v22  ;;  %v3049_v28 = vld [vmem:[%s3911_s26 + $0x18] sm:$0xf] }
 0x146   : > { %1009 = vmatpush.bf16.msra.mxu0 %v3098_v61  ;;  %v3493_v29 = vld [vmem:[%s3911_s26 + $0x20] sm:$0xf0]  ;;  %v3492_v30 = vld [vmem:[%s3911_s26 + $0x1c] sm:$0xf]  ;;  %v3051_v31 = vld [vmem:[%s3911_s26 + $0x24] sm:$0xf0]  ;;  %v3094_v32 = vor.u32 %v3503_v24, %v3093_v23 }
 0x147   : > { %1023 = vmatpush.bf16.msra.mxu1 %v3102_v62  ;;  %v3050_v33 = vor.u32 %v3493_v29, %v3049_v28  ;;  %v3081_v34 = vld [vmem:[%s3911_s26 + $0x50] sm:$0xf]  ;;  %v3500_v35 = vld [vmem:[%s3911_s26 + $0x58] sm:$0xf0]  ;;  %v3054_v36 = vor.u32 %v3492_v30, %v3051_v31  ;;  %v3037_v37 = vld [vmem:[%s3911_s26] sm:$0xf] }
 0x148   : > { %1036 = vmatpush.bf16.msra.mxu2 %v3118_v14  ;;  %v3490_v38 = vld [vmem:[%s3911_s26 + $0x8] sm:$0xf0]  ;;  %v3489_v39 = vld [vmem:[%s3911_s26 + $0x4] sm:$0xf]  ;;  %v3039_v40 = vld [vmem:[%s3911_s26 + $0xc] sm:$0xf0]  ;;  %v3082_v42 = vor.u32 %v3500_v35, %v3081_v34 }
 0x149   : > { %v4014_v41 = vld [vmem:[#allocation2] sm:$0xff]  ;;  %v3038_v43 = vor.u32 %v3490_v38, %v3037_v37  ;;  %v4016_v44 = vld [vmem:[#allocation2 + $0x8] sm:$0xff]  ;;  %v3069_v45 = vld [vmem:[%s3911_s26 + $0x38] sm:$0xf]  ;;  %v3042_v47 = vor.u32 %v3489_v39, %v3039_v40  ;;  %vm1070_vm7 = vcmask 261120   ;;  %vm1149_vm8 = vcmask 1043456  }
 0x14a   : > { %1010 = vmatpush.bf16.msra.mxu0 %v3086_v3  ;;  %v3497_v46 = vld [vmem:[%s3911_s26 + $0x40] sm:$0xf0]  ;;  %v870_v48 = vpack.c.bf16 %v4016_v44, %v4014_v41  ;;  %v3057_v50 = vld [vmem:[%s3911_s26 + $0x20] sm:$0xf]  ;;  %v3494_v51 = vld [vmem:[%s3911_s26 + $0x28] sm:$0xf0] }
 0x14b   : > { %1024 = vmatpush.bf16.msra.mxu1 %v3090_v7  ;;  %v3070_v49 = vor.u32 %v3497_v46, %v3069_v45  ;;  %v3058_v52 = vor.u32 %v3494_v51, %v3057_v50  ;;  %v3045_v53 = vld [vmem:[%s3911_s26 + $0x8] sm:$0xf]  ;;  %v3491_v54 = vld [vmem:[%s3911_s26 + $0x10] sm:$0xf0]  ;;  %v4027_v56 = vld [vmem:[%s3920_s18] sm:$0x7] }
 0x14c   : > { %1037 = vmatpush.bf16.msra.mxu2 %v3106_v25  ;;  %v3046_v55 = vor.u32 %v3491_v54, %v3045_v53  ;;  %v873_v57 = vperm.slane %v4027_v56, 0  ;;  %v874_v58 = vperm.slane %v4027_v56, 1  ;;  %s3776_s18 = smov 96   ;;  %v875_v13 = vperm.slane %v4027_v56, 2  ;;  %s3777_s26 = smov 64  }
 0x14d   : > { %s4759_s27 = sld [smem:[#allocation10_spill]]  ;;  %vm1119_vm9 = vcmask 64512   ;;  %s3778_s5 = smov 32  }
 0x14e   : > { %1011 = vmatpush.bf16.msra.mxu0 %v3074_v15  ;;  %p3447_p5 = scmp.ne.s32.totalorder %s3892_s30, 1 }
 0x14f   : > { %1025 = vmatpush.bf16.msra.mxu1 %v3078_v19  ;;  %s4774_s25 = sld [smem:[#allocation18_spill]] (!%p3447_p5) }
 0x150   : > { %1038 = vmatpush.bf16.msra.mxu2 %v3094_v32 }
 0x152   : > { %1012 = vmatpush.bf16.msra.mxu0 %v3062_v26 }
 0x153   : > { %1026 = vmatpush.bf16.msra.mxu1 %v3066_v27  ;;  %v4061_v27 = vld [vmem:[%s4759_s27] ss:$0 sm:$0xff] }
 0x154   : > { %1039 = vmatpush.bf16.msra.mxu2 %v3082_v42 }
 0x156   : > { %1013 = vmatpush.bf16.msra.mxu0 %v3050_v33  ;;  %v4068_v33 = vld [vmem:[%s4759_s27 + $0x1] ss:$0 sm:$0xff] }
 0x157   : > { %1027 = vmatpush.bf16.msra.mxu1 %v3054_v36 }
 0x158   : > { %1040 = vmatpush.bf16.msra.mxu2 %v3070_v49 }
 0x15a   : > { %1014 = vmatpush.bf16.msra.mxu0 %v3038_v43 }
 0x15b   : > { %1028 = vmatpush.bf16.msra.mxu1 %v3042_v47 }
 0x15c   : > { %1041 = vmatpush.bf16.msra.mxu2 %v3058_v52 }
 0x15d   : > { %1015 = vmatmul.bf16.vlgmr.msra.gmra.mxu0 %v870_v48 }
 0x15e   : > { %1029 = vmatmul.bf16.vlgmr.msra.gmra.mxu1 %v870_v48 }
 0x160   : > { %1042 = vmatpush.bf16.msra.mxu2 %v3046_v55 }
 0x163   : > { %1043 = vmatmul.bf16.vlgmr.msra.gmra.mxu2 %v870_v48 }
 0x1da   : > { %v1016_v59 = vpop.f32.mrf.mxu0 }
 0x1db   : > { %v1030_v60 = vpop.f32.mrf.mxu1  ;;  %v1017_v61 = vadd.f32 %v1016_v59, %v873_v57 }
 0x1dc   : > { %v1031_v62 = vadd.f32 %v1030_v60, %v874_v58 }
 0x1dd   : > { %v1066_v0 = vpack.c.bf16 %v1017_v61, %v1017_v61 }
 0x1de   : > { %v1068_v63 = vpack.c.bf16 %v1031_v62, %v1031_v62 }
 0x1df   : > { %v1221_v6 = vunpack.c.l.b16 %v1066_v0 }
 0x1e0   : > { %v1226_v1 = vunpack.c.l.b16 %v1068_v63  ;;  %v1075_v2 = vsel %vm1070_vm7, %v1068_v63, 0 }
 0x1e1   : > { %1084 = vmatpush.bf16.xpose.msra.mxu3 %v1075_v2  ;;  %v4036_v10 = vpack.c.b16 %v1221_v6, %v1221_v6 }
 0x1e2   : > { %v4032_v3 = vpack.c.b16 %v1226_v1, %v1226_v1  ;;  %v1018_v4 = vpop.f32.mrf.mxu0 }
 0x1e3   : > { %v1032_v5 = vpop.f32.mrf.mxu1  ;;  %v1019_v8 = vadd.f32 %v1018_v4, %v873_v57 }
 0x1e4   : > { %v1033_v7 = vadd.f32 %v1032_v5, %v874_v58  ;;  %1228 = vrot.lane.b32.xlu0 %v4032_v3, %s3776_s18 }
 0x1e5   : > { %v1067_v14 = vpack.c.bf16 %v1019_v8, %v1019_v8 }
 0x1e6   : > { %v1069_v9 = vpack.c.bf16 %v1033_v7, %v1033_v7  ;;  %v1044_v16 = vpop.f32.mrf.mxu2 }
 0x1e7   : > { %v1045_v17 = vadd.f32 %v1044_v16, %v875_v13  ;;  %v1250_v18 = vunpack.c.l.b16 %v1067_v14 }
 0x1e8   : > { %v1255_v11 = vunpack.c.l.b16 %v1069_v9  ;;  %3131 = vmatmul.msk.bf16.vlgmr.msra.gmra.mxu3 %vm1070_vm7, %v1066_v0  ;;  %v1094_v12 = vsel %vm1070_vm7, %v1069_v9, 0 }
 0x1e9   : > { %1103 = vmatpush.bf16.xpose.msrb.mxu3 %v1094_v12  ;;  %v1144_v19 = vpack.c.bf16 %v1045_v17, %v1045_v17  ;;  %v4048_v21 = vpack.c.b16 %v1250_v18, %v1250_v18 }
 0x1ea   : > { %v4041_v15 = vpack.c.b16 %v1255_v11, %v1255_v11 }
 0x1eb   : > { %v1151_v20 = vsel %vm1149_vm8, %v1144_v19, 0  ;;  %v1307_v52 = vunpack.c.l.b16 %v1144_v19 }
 0x1ec   : > { %1257 = vrot.lane.b32.xlu2 %v4041_v15, %s3776_s18  ;;  %1223 = vrot.lane.b32.xlu0 %v4036_v10, %s3776_s18 }
 0x1ed   : > { %v4075_v53 = vpack.c.b16 %v1307_v52, %v1307_v52 }
 0x1ee   : > { %v1046_v39 = vpop.f32.mrf.mxu2 }
 0x1ef   : > { %v1047_v54 = vadd.f32 %v1046_v39, %v875_v13 }
 0x1f1   : > { %1160 = vmatpush.bf16.msra.mxu3 %v1151_v20  ;;  %v4081_v55 = vpack.c.bf16 %v1047_v54, %v1047_v54 }
 0x1f3   : > { %v1170_v56 = vsel %vm1149_vm8, %v4081_v55, 0 }
 0x1f4   : > { %1252 = vrot.lane.b32.xlu2 %v4048_v21, %s3776_s18  ;;  %1179 = vmatpush.bf16.msrb.mxu0 %v1170_v56 }
 0x1f8   : > { %3132 = vmatmul.msk.bf16.vlgmr.msrb.gmra.mxu3 %vm1070_vm7, %v1067_v14 }
 0x1fc   : > { %1386 = vrot.lane.b32.xlu2 %v4036_v10, %s3777_s26 }
 0x246   : > { %v1258_v22 = vpop.permute.xlu2 %1257 }
 0x247   : > { %v1263_v23 = vsel %vm1070_vm7, %v1258_v22, 0 }
 0x248   : > { %1272 = vmatpush.bf16.xpose.msrb.mxu3 %v1263_v23 }
 0x24e   : > { %v1253_v62 = vpop.permute.xlu2 %1252 }
 0x256   : > { %v1229_v24 = vpop.permute.xlu0 %1228  ;;  %v1387_v63 = vpop.permute.xlu2 %1386 }
 0x257   : > { %v1234_v25 = vsel %vm1070_vm7, %v1229_v24, 0 }
 0x258   : > { %1243 = vmatpush.bf16.xpose.msrb.mxu2 %v1234_v25 }
 0x25e   : > { %v1224_v26 = vpop.permute.xlu0 %1223 }
 0x25f   : > { %3144 = vmatmul.msk.bf16.vlgmr.msrb.gmra.mxu2 %vm1070_vm7, %v1224_v26 }
 0x26b   : > { %v1086_v28 = vpop.f32.mrf.mxu3 }
 0x26c   : > { %v1109_v29 = vmul.f32 0.17677669, %v1086_v28 }
 0x26e   : > { %v1117_v30 = vadd.f32 %v4061_v27, %v1109_v29 }
 0x270   : > { %v1120_v31 = vsel %vm1119_vm9, %v1117_v30, -inf }
 0x271   : > { %1121 = vmax.xlane.f32.xlu1 %v1120_v31 }
 0x273   : > { %v1088_v32 = vpop.f32.mrf.mxu3 }
 0x27b   : > { %v1105_v34 = vpop.f32.mrf.mxu3 }
 0x27c   : > { %v1110_v35 = vmul.f32 0.17677669, %v1105_v34  ;;  %v3514_v34 = vld [vmem:[%s3906_s24 + $0x8] sm:$0xff] }
 0x27d   : > { %1207 = vmatpush.bf16.msrb.mxu1 %v3514_v34 }
 0x27e   : > { %v1118_v36 = vadd.f32 %v4068_v33, %v1110_v35 }
 0x280   : > { %v1123_v37 = vsel %vm1119_vm9, %v1118_v36, -inf }
 0x281   : > { %1124 = vmax.xlane.f32.xlu0 %v1123_v37 }
 0x283   : > { %v1107_v38 = vpop.f32.mrf.mxu3 }
 0x284   : > { %v3513_v38 = vld [vmem:[%s3906_s24] sm:$0xff] }
 0x285   : > { %1208 = vmatpush.bf16.msrb.mxu1 %v3513_v38 }
 0x2e2   : > { %v1245_v40 = vpop.f32.mrf.mxu2 }
 0x2e3   : > { %v1278_v42 = vmul.f32 0.17677669, %v1245_v40 }
 0x2e4   : > { %v1122_v43 = vpop.xlane.xlu1 %1121 }
 0x2e5   : > { %v1126_v45 = vsub.f32 %v1117_v30, %v1122_v43  ;;  %v1280_v46 = vadd.f32 %v4061_v27, %v1278_v42  ;;  %v1331_v43 = vunpack.c.l.b16 %v4081_v55 }
 0x2e7   : > { %v1128_v47 = vmul.f32 1.442695, %v1126_v45  ;;  %v1282_v48 = vsel %vm1119_vm9, %v1280_v46, -inf }
 0x2e8   : > { %1283 = vmax.xlane.f32.xlu2 %v1282_v48 }
 0x2e9   : > { %3642 = vpow2.f32 %v1128_v47 }
 0x2ea   : > { %v1247_v49 = vpop.f32.mrf.mxu2 }
 0x2ef   : > { %v3643_v50 = vpop.eup %3642 }
 0x2f0   : > { %v1132_v51 = vsel %vm1119_vm9, %v3643_v50, 0.0 }
 0x2f1   : > { %1133 = vadd.xlane.f32.xlu1 %v1132_v51 }
 0x2f4   : > { %v1125_v57 = vpop.xlane.xlu0 %1124 }
 0x2f5   : > { %v1127_v58 = vsub.f32 %v1118_v36, %v1125_v57 }
 0x2f7   : > { %v1130_v59 = vmul.f32 1.442695, %v1127_v58 }
 0x2f9   : > { %3644 = vpow2.f32 %v1130_v59 }
 0x2ff   : > { %v3645_v60 = vpop.eup %3644 }
 0x300   : > { %1309 = vrot.lane.b32.xlu2 %v4075_v53, %s3776_s18  ;;  %v1135_v61 = vsel %vm1119_vm9, %v3645_v60, 0.0 }
 0x30a   : > { %1388 = vrot.lane.b32.xlu1 %v4032_v3, %s3777_s26 }
 0x334   : > { %1136 = vadd.xlane.f32.xlu1 %v1135_v61 }
 0x34d   : > { %1409 = vrot.lane.b32.xlu1 %v4048_v21, %s3777_s26 }
 0x35b   : > { %v1284_v0 = vpop.xlane.xlu2 %1283 }
 0x35c   : > { %v1288_v1 = vsub.f32 %v1280_v46, %v1284_v0  ;;  %v4107_v46 = vpack.c.b16 %v1331_v43, %v1331_v43 }
 0x35e   : > { %v1290_v2 = vmul.f32 1.442695, %v1288_v1 }
 0x360   : > { %3646 = vpow2.f32 %v1290_v2 }
 0x363   : > { %v1310_v11 = vpop.permute.xlu2 %1309 }
 0x364   : > { %v1134_v4 = vpop.xlane.xlu1 %1133  ;;  %v1315_v12 = vsel %vm1149_vm8, %v1310_v11, 0 }
 0x365   : > { %3648 = vrcp.f32 %v1134_v4  ;;  %1324 = vmatpush.bf16.msra.mxu0 %v1315_v12 }
 0x366   : > { %v3647_v5 = vpop.eup %3646 }
 0x367   : > { %v1294_v6 = vsel %vm1119_vm9, %v3647_v5, 0.0 }
 0x368   : > { %1295 = vadd.xlane.f32.xlu0 %v1294_v6 }
 0x36b   : > { %v3649_v7 = vpop.eup %3648 }
 0x36c   : > { %v1140_v8 = vmul.f32 %v3649_v7, %v3643_v50 }
 0x36e   : > { %v1142_v9 = vpack.c.bf16 %v1140_v8, %v1140_v8 }
 0x370   : > { %3133 = vmatmul.msk.bf16.vlgmr.msra.gmra.mxu3 %vm1119_vm9, %v1142_v9 }
 0x37c   : > { %v1389_v13 = vpop.permute.xlu1 %1388  ;;  %1411 = vrot.lane.b32.xlu0 %v4041_v15, %s3777_s26 }
 0x37d   : > { %v1394_v14 = vsel %vm1070_vm7, %v1389_v13, 0 }
 0x37e   : > { %1403 = vmatpush.bf16.xpose.msra.mxu3 %v1394_v14 }
 0x380   : > { %3145 = vmatmul.msk.bf16.vlgmr.msrb.gmra.mxu3 %vm1070_vm7, %v1253_v62 }
 0x390   : > { %3157 = vmatmul.msk.bf16.vlgmr.msra.gmra.mxu3 %vm1070_vm7, %v1387_v63 }
 0x3a7   : > { %v1137_v16 = vpop.xlane.xlu1 %1136 }
 0x3a8   : > { %3650 = vrcp.f32 %v1137_v16  ;;  %v3516_v16 = vld [vmem:[%s3906_s24 + $0x18] sm:$0xff] }
 0x3a9   : > { %1376 = vmatpush.bf16.msra.mxu2 %v3516_v16 }
 0x3ae   : > { %v3651_v17 = vpop.eup %3650 }
 0x3af   : > { %v1141_v18 = vmul.f32 %v3651_v17, %v3645_v60 }
 0x3b1   : > { %v1143_v19 = vpack.c.bf16 %v1141_v18, %v1141_v18 }
 0x3b3   : > { %3134 = vmatmul.msk.bf16.vlgmr.msrb.gmra.mxu0 %vm1119_vm9, %v1143_v19  ;;  %v3515_v19 = vld [vmem:[%s3906_s24 + $0x10] sm:$0xff] }
 0x3b4   : > { %1377 = vmatpush.bf16.msra.mxu2 %v3515_v19  ;;  %v3520_v19 = vld [vmem:[%s3906_s24 + $0x38] sm:$0xff] }
 0x3bf   : > { %v1410_v29 = vpop.permute.xlu1 %1409 }
 0x3db   : > { %v1296_v20 = vpop.xlane.xlu0 %1295 }
 0x3dc   : > { %3652 = vrcp.f32 %v1296_v20 }
 0x3e2   : > { %v3653_v22 = vpop.eup %3652 }
 0x3e3   : > { %v1302_v23 = vmul.f32 %v3653_v22, %v3647_v5 }
 0x3e5   : > { %v1304_v24 = vpack.c.bf16 %v1302_v23, %v1302_v23 }
 0x3e7   : > { %3146 = vmatmul.msk.bf16.vlgmr.msra.gmra.mxu0 %vm1119_vm9, %v1304_v24 }
 0x3ee   : > { %v1412_v25 = vpop.permute.xlu0 %1411 }
 0x3ef   : > { %v1417_v26 = vsel %vm1070_vm7, %v1412_v25, 0 }
 0x3f0   : > { %1426 = vmatpush.bf16.xpose.msrb.mxu0 %v1417_v26 }
 0x3f3   : > { %v1162_v28 = vpop.f32.mrf.mxu3 }
 0x3f7   : > { %3158 = vmatmul.msk.bf16.vlgmr.msrb.gmra.mxu0 %vm1070_vm7, %v1410_v29 }
 0x3fb   : > { %v1164_v30 = vpop.f32.mrf.mxu3 }
 0x403   : > { %v1274_v31 = vpop.f32.mrf.mxu3 }
 0x404   : > { %v1279_v32 = vmul.f32 0.17677669, %v1274_v31 }
 0x406   : > { %v1281_v35 = vadd.f32 %v4068_v33, %v1279_v32 }
 0x408   : > { %v1285_v36 = vsel %vm1119_vm9, %v1281_v35, -inf }
 0x409   : > { %1286 = vmax.xlane.f32.xlu0 %v1285_v36 }
 0x40b   : > { %v1276_v37 = vpop.f32.mrf.mxu3 }
 0x413   : > { %v1405_v39 = vpop.f32.mrf.mxu3 }
 0x414   : > { %v1432_v40 = vmul.f32 0.17677669, %v1405_v39 }
 0x416   : > { %v1434_v42 = vadd.f32 %v4061_v27, %v1432_v40 }
 0x418   : > { %v1436_v45 = vsel %vm1119_vm9, %v1434_v42, -inf }
 0x419   : > { %1437 = vmax.xlane.f32.xlu2 %v1436_v45 }
 0x41b   : > { %v1407_v47 = vpop.f32.mrf.mxu3 }
 0x41d   : > { %1333 = vrot.lane.b32.xlu0 %v4107_v46, %s3776_s18 }
 0x425   : > { %1536 = vrot.lane.b32.xlu0 %v4032_v3, %s3778_s5 }
 0x42d   : > { %1534 = vrot.lane.b32.xlu0 %v4036_v10, %s3778_s5 }
 0x430   : > { %v1181_v48 = vpop.f32.mrf.mxu0 }
 0x431   : > { %v1185_v49 = vpack.c.bf16 %v1181_v48, %v1162_v28  ;;  %1460 = vrot.lane.b32.xlu2 %v4075_v53, %s3777_s26 }
 0x433   : > { %3143 = vmatmul.msk.bf16.vlgmr.msrb.gmra.mxu1 %vm1070_vm7, %v1185_v49 }
 0x438   : > { %v1183_v50 = vpop.f32.mrf.mxu0 }
 0x464   : > { %v4118_v51 = vpop.f32.mrf.mxu0 }
 0x46c   : > { %v1328_v52 = vpop.f32.mrf.mxu0 }
 0x474   : > { %v1428_v54 = vpop.f32.mrf.mxu0 }
 0x475   : > { %v1433_v55 = vmul.f32 0.17677669, %v1428_v54 }
 0x477   : > { %v1435_v56 = vadd.f32 %v4068_v33, %v1433_v55 }
 0x479   : > { %v1439_v3 = vsel %vm1119_vm9, %v1435_v56, -inf }
 0x47a   : > { %1440 = vmax.xlane.f32.xlu0 %v1439_v3 }
 0x47c   : > { %v1430_v57 = vpop.f32.mrf.mxu0  ;;  %v1287_v10 = vpop.xlane.xlu0 %1286 }
 0x47d   : > { %v1289_v58 = vsub.f32 %v1281_v35, %v1287_v10 }
 0x47f   : > { %v1292_v59 = vmul.f32 1.442695, %v1289_v58 }
 0x481   : > { %3654 = vpow2.f32 %v1292_v59 }
 0x487   : > { %v3655_v60 = vpop.eup %3654 }
 0x488   : > { %v1297_v61 = vsel %vm1119_vm9, %v3655_v60, 0.0 }
 0x489   : > { %1298 = vadd.xlane.f32.xlu1 %v1297_v61  ;;  %v3518_v61 = vld [vmem:[%s3906_s24 + $0x28] sm:$0xff] }
 0x48a   : > { %1524 = vmatpush.bf16.msrb.mxu3 %v3518_v61 }
 0x48c   : > { %v1438_v62 = vpop.xlane.xlu2 %1437 }
 0x48d   : > { %v1442_v63 = vsub.f32 %v1434_v42, %v1438_v62  ;;  %v3517_v62 = vld [vmem:[%s3906_s24 + $0x20] sm:$0xff] }
 0x48e   : > { %1525 = vmatpush.bf16.msrb.mxu3 %v3517_v62  ;;  %v3299_v62 = vld [vmem:[%s3934_s4 + $0xf0] sm:$0xf0] }
 0x48f   : > { %v1444_v0 = vmul.f32 1.442695, %v1442_v63  ;;  %v1334_v1 = vpop.permute.xlu0 %1333  ;;  %v3636_v63 = vld [vmem:[%s4760_s22] ss:$0 sm:$0xff] }
 0x490   : > { %v1339_v2 = vsel %vm1149_vm8, %v1334_v1, 0 }
 0x491   : > { %3656 = vpow2.f32 %v1444_v0  ;;  %1348 = vmatpush.bf16.msra.mxu1 %v1339_v2 }
 0x494   : > { %v1461_v4 = vpop.permute.xlu2 %1460 }
 0x495   : > { %v1466_v5 = vsel %vm1149_vm8, %v1461_v4, 0 }
 0x496   : > { %1475 = vmatpush.bf16.msrb.mxu1 %v1466_v5 }
 0x497   : > { %v3657_v6 = vpop.eup %3656  ;;  %v1537_v7 = vpop.permute.xlu0 %1536 }
 0x498   : > { %v1542_v8 = vsel %vm1070_vm7, %v1537_v7, 0  ;;  %v1448_v9 = vsel %vm1119_vm9, %v3657_v6, 0.0 }
 0x499   : > { %1551 = vmatpush.bf16.xpose.msra.mxu0 %v1542_v8  ;;  %1449 = vadd.xlane.f32.xlu2 %v1448_v9 }
 0x49f   : > { %v1535_v11 = vpop.permute.xlu0 %1534 }
 0x4a0   : > { %3170 = vmatmul.msk.bf16.vlgmr.msra.gmra.mxu0 %vm1070_vm7, %v1535_v11 }
 0x4a1   : > { %1672 = vmatpush.bf16.msrb.mxu0 %v3520_v19  ;;  %v3265_v19 = vld [vmem:[%s3934_s4 + $0xa0] sm:$0xf] }
 0x4a2   : > { %1559 = vrot.lane.b32.xlu1 %v4041_v15, %s3778_s5 }
 0x4aa   : > { %1481 = vrot.lane.b32.xlu1 %v4107_v46, %s3777_s26  ;;  %s4762_s26 = scalar_lea.vmem %s4724_s9, %s3898_s20 }
 0x4b0   : > { %v1210_v39 = vpop.f32.mrf.mxu1 }
 0x4b1   : > { %1557 = vrot.lane.b32.xlu2 %v4048_v21, %s3778_s5  ;;  %v1218_v0 = vadd.f32 %v3636_v63, %v1210_v39 }
 0x4b8   : > { %v4144_v40 = vpop.f32.mrf.mxu1 }
 0x4ed   : > { %v1441_v12 = vpop.xlane.xlu0 %1440 }
 0x4ee   : > { %v1443_v13 = vsub.f32 %v1435_v56, %v1441_v12 }
 0x4f0   : > { %v1446_v14 = vmul.f32 1.442695, %v1443_v13 }
 0x4f2   : > { %3658 = vpow2.f32 %v1446_v14 }
 0x4f8   : > { %v3659_v17 = vpop.eup %3658 }
 0x4f9   : > { %v1451_v18 = vsel %vm1119_vm9, %v3659_v17, 0.0 }
 0x4fa   : > { %1452 = vadd.xlane.f32.xlu2 %v1451_v18 }
 0x4fc   : > { %v1299_v20 = vpop.xlane.xlu1 %1298 }
 0x4fd   : > { %3660 = vrcp.f32 %v1299_v20 }
 0x503   : > { %v3661_v15 = vpop.eup %3660 }
 0x504   : > { %v1303_v22 = vmul.f32 %v3661_v15, %v3655_v60 }
 0x506   : > { %v1305_v23 = vpack.c.bf16 %v1303_v22, %v1303_v22 }
 0x508   : > { %3147 = vmatmul.msk.bf16.vlgmr.msra.gmra.mxu1 %vm1119_vm9, %v1305_v23 }
 0x50c   : > { %v1450_v21 = vpop.xlane.xlu2 %1449 }
 0x50d   : > { %3662 = vrcp.f32 %v1450_v21 }
 0x513   : > { %v3663_v24 = vpop.eup %3662 }
 0x514   : > { %v1456_v25 = vmul.f32 %v3663_v24, %v3657_v6  ;;  %v1560_v26 = vpop.permute.xlu1 %1559  ;;  %v1558_v38 = vpop.permute.xlu2 %1557 }
 0x515   : > { %v1565_v28 = vsel %vm1070_vm7, %v1560_v26, 0 }
 0x516   : > { %v1458_v29 = vpack.c.bf16 %v1456_v25, %v1456_v25  ;;  %1574 = vmatpush.bf16.xpose.msra.mxu1 %v1565_v28 }
 0x518   : > { %3159 = vmatmul.msk.bf16.vlgmr.msrb.gmra.mxu1 %vm1119_vm9, %v1458_v29 }
 0x51c   : > { %v1482_v30 = vpop.permute.xlu1 %1481 }
 0x51d   : > { %v1487_v31 = vsel %vm1149_vm8, %v1482_v30, 0  ;;  %v1553_v32 = vpop.f32.mrf.mxu0  ;;  %v3519_v30 = vld [vmem:[%s3906_s24 + $0x30] sm:$0xff] }
 0x51e   : > { %v1580_v34 = vmul.f32 0.17677669, %v1553_v32  ;;  %1496 = vmatpush.bf16.msrb.mxu2 %v1487_v31  ;;  %1673 = vmatpush.bf16.msrb.mxu0 %v3519_v30 }
 0x520   : > { %v1582_v35 = vadd.f32 %v4061_v27, %v1580_v34 }
 0x522   : > { %v1584_v36 = vsel %vm1119_vm9, %v1582_v35, -inf }
 0x523   : > { %1585 = vmax.xlane.f32.xlu1 %v1584_v36 }
 0x525   : > { %v1555_v37 = vpop.f32.mrf.mxu0 }
 0x526   : > { %v1219_v37 = vadd.f32 %v3636_v63, %v4144_v40  ;;  %v3305_v63 = vld [vmem:[%s3934_s4 + $0xe8] sm:$0xf] }
 0x528   : > { %3171 = vmatmul.msk.bf16.vlgmr.msra.gmra.mxu1 %vm1070_vm7, %v1558_v38 }
 0x56d   : > { %v1453_v43 = vpop.xlane.xlu2 %1452 }
 0x56e   : > { %3664 = vrcp.f32 %v1453_v43 }
 0x574   : > { %v3665_v48 = vpop.eup %3664 }
 0x575   : > { %v1457_v27 = vmul.f32 %v3665_v48, %v3659_v17  ;;  %v3779_v48 = vmov 128.0  }
 0x577   : > { %v1459_v50 = vpack.c.bf16 %v1457_v27, %v1457_v27 }
 0x585   : > { %v1350_v42 = vpop.f32.mrf.mxu1 }
 0x586   : > { %v1354_v45 = vpack.c.bf16 %v1350_v42, %v4118_v51 }
 0x588   : > { %3156 = vmatmul.msk.bf16.vlgmr.msra.gmra.mxu2 %vm1070_vm7, %v1354_v45 }
 0x58d   : > { %v1352_v47 = vpop.f32.mrf.mxu1 }
 0x595   : > { %v1477_v49 = vpop.f32.mrf.mxu1 }
 0x596   : > { %v1586_v52 = vpop.xlane.xlu1 %1585 }
 0x597   : > { %v1590_v54 = vsub.f32 %v1582_v35, %v1586_v52 }
 0x598   : > { %3160 = vmatmul.msk.bf16.vlgmr.msrb.gmra.mxu2 %vm1119_vm9, %v1459_v50 }
 0x599   : > { %v1592_v55 = vmul.f32 1.442695, %v1590_v54 }
 0x59b   : > { %3666 = vpow2.f32 %v1592_v55 }
 0x59d   : > { %v1479_v56 = vpop.f32.mrf.mxu1 }
 0x5a1   : > { %v3667_v3 = vpop.eup %3666 }
 0x5a2   : > { %v1596_v51 = vsel %vm1119_vm9, %v3667_v3, 0.0 }
 0x5a3   : > { %1597 = vadd.xlane.f32.xlu2 %v1596_v51 }
 0x5a5   : > { %v1576_v57 = vpop.f32.mrf.mxu1 }
 0x5a6   : > { %v1581_v10 = vmul.f32 0.17677669, %v1576_v57 }
 0x5a8   : > { %v1583_v58 = vadd.f32 %v4068_v33, %v1581_v10 }
 0x5aa   : > { %v1587_v59 = vsel %vm1119_vm9, %v1583_v58, -inf }
 0x5ab   : > { %1588 = vmax.xlane.f32.xlu0 %v1587_v59  ;;  %v3551_v59 = vld [vmem:[%s3934_s4 + $0xec] sm:$0xf0] }
 0x5ad   : > { %v1578_v60 = vpop.f32.mrf.mxu1 }
 0x5ae   : > { %v3549_v60 = vld [vmem:[%s3934_s4 + $0xe4] sm:$0xf] }
 0x5bb   : > { %1608 = vrot.lane.b32.xlu2 %v4075_v53, %s3778_s5 }
 0x60b   : > { %v1379_v1 = vpop.f32.mrf.mxu2 }
 0x60c   : > { %v1384_v2 = vadd.f32 %v1379_v1, %v1218_v0  ;;  %v3552_v0 = vld [vmem:[%s3934_s4 + $0xf4] sm:$0xf0]  ;;  %v3302_v1 = vor.u32 %v3549_v60, %v3299_v62  ;;  %v3225_v62 = vld [vmem:[%s3934_s4 + $0x48] sm:$0xf] }
 0x613   : > { %v1381_v33 = vpop.f32.mrf.mxu2 }
 0x614   : > { %v1385_v39 = vadd.f32 %v1381_v33, %v1219_v37  ;;  %v3550_v33 = vld [vmem:[%s3934_s4 + $0xec] sm:$0xf]  ;;  %v3540_v37 = vld [vmem:[%s3934_s4 + $0x94] sm:$0xf0] }
 0x616   : > { %v1598_v4 = vpop.xlane.xlu2 %1597 }
 0x617   : > { %3668 = vrcp.f32 %v1598_v4  ;;  %v3307_v4 = vld [vmem:[%s3934_s4 + $0xf8] sm:$0xf0] }
 0x61b   : > { %v1498_v5 = vpop.f32.mrf.mxu2 }
 0x61c   : > { %v1502_v6 = vpack.c.bf16 %v1498_v5, %v1477_v49  ;;  %v3310_v5 = vor.u32 %v3550_v33, %v3307_v4  ;;  %v3227_v33 = vld [vmem:[%s3934_s4 + $0x58] sm:$0xf0] }
 0x61d   : > { %v3669_v7 = vpop.eup %3668 }
 0x61e   : > { %v1604_v8 = vmul.f32 %v3669_v7, %v3667_v3  ;;  %v1589_v53 = vpop.xlane.xlu0 %1588  ;;  %3169 = vmatmul.msk.bf16.vlgmr.msrb.gmra.mxu3 %vm1070_vm7, %v1502_v6  ;;  %v1609_v9 = vpop.permute.xlu2 %1608  ;;  %v3281_v6 = vld [vmem:[%s3934_s4 + $0xc0] sm:$0xf]  ;;  %v3547_v7 = vld [vmem:[%s3934_s4 + $0xcc] sm:$0xf0]  ;;  %1988 = vmatpush.bf16.msra.mxu0 %v3310_v5 }
 0x61f   : > { %v1591_v11 = vsub.f32 %v1583_v58, %v1589_v53  ;;  %v1614_v12 = vsel %vm1149_vm8, %v1609_v9, 0  ;;  %v3297_v58 = vld [vmem:[%s3934_s4 + $0xe0] sm:$0xf]  ;;  %v3282_v53 = vor.u32 %v3547_v7, %v3281_v6  ;;  %v3283_v9 = vld [vmem:[%s3934_s4 + $0xd0] sm:$0xf0] }
 0x620   : > { %v1606_v13 = vpack.c.bf16 %v1604_v8, %v1604_v8  ;;  %1623 = vmatpush.bf16.msra.mxu2 %v1614_v12  ;;  %v3298_v61 = vor.u32 %v3551_v59, %v3297_v58  ;;  %v3545_v8 = vld [vmem:[%s3934_s4 + $0xc4] sm:$0xf]  ;;  %v3548_v12 = vld [vmem:[%s3934_s4 + $0xd4] sm:$0xf0]  ;;  %v3531_v58 = vld [vmem:[%s3934_s4 + $0x4c] sm:$0xf0] }
 0x621   : > { %v1594_v14 = vmul.f32 1.442695, %v1591_v11  ;;  %v3289_v11 = vld [vmem:[%s3934_s4 + $0xc8] sm:$0xf]  ;;  %v3529_v59 = vld [vmem:[%s3934_s4 + $0x44] sm:$0xf] }
 0x622   : > { %1946 = vmatpush.bf16.msrb.mxu1 %v3298_v61  ;;  %v3219_v61 = vld [vmem:[%s3934_s4 + $0x50] sm:$0xf0]  ;;  %v3201_v5 = vld [vmem:[%s3934_s4 + $0x20] sm:$0xf]  ;;  %v3527_v6 = vld [vmem:[%s3934_s4 + $0x2c] sm:$0xf0] }
 0x623   : > { %3670 = vpow2.f32 %v1594_v14  ;;  %v1500_v16 = vpop.f32.mrf.mxu2  ;;  %3172 = vmatmul.msk.bf16.vlgmr.msra.gmra.mxu2 %vm1119_vm9, %v1606_v13  ;;  %v3286_v13 = vor.u32 %v3545_v8, %v3283_v9  ;;  %v3290_v14 = vor.u32 %v3548_v12, %v3289_v11  ;;  %v3525_v7 = vld [vmem:[%s3934_s4 + $0x24] sm:$0xf]  ;;  %v3202_v8 = vor.u32 %v3527_v6, %v3201_v5  ;;  %v3209_v9 = vld [vmem:[%s3934_s4 + $0x28] sm:$0xf]  ;;  %v3528_v11 = vld [vmem:[%s3934_s4 + $0x34] sm:$0xf0] }
 0x624   : > { %1960 = vmatpush.bf16.msrb.mxu2 %v3302_v1  ;;  %v3546_v16 = vld [vmem:[%s3934_s4 + $0xcc] sm:$0xf] }
 0x626   : > { %1947 = vmatpush.bf16.msrb.mxu1 %v3282_v53  ;;  %v3203_v53 = vld [vmem:[%s3934_s4 + $0x30] sm:$0xf0] }
 0x627   : > { %v3206_v12 = vor.u32 %v3525_v7, %v3203_v53 }
 0x628   : > { %1961 = vmatpush.bf16.msrb.mxu2 %v3286_v13  ;;  %v3210_v13 = vor.u32 %v3528_v11, %v3209_v9 }
 0x629   : > { %v3671_v17 = vpop.eup %3670 }
 0x62a   : > { %v1599_v18 = vsel %vm1119_vm9, %v3671_v17, 0.0 }
 0x62b   : > { %1600 = vadd.xlane.f32.xlu0 %v1599_v18 }
 0x63f   : > { %1629 = vrot.lane.b32.xlu0 %v4107_v46, %s3778_s5 }
 0x69e   : > { %v1601_v22 = vpop.xlane.xlu0 %1600 }
 0x69f   : > { %3672 = vrcp.f32 %v1601_v22 }
 0x6a0   : > { %3674 = vrcp.f32 %v3779_v48  ;;  %v3535_v48 = vld [vmem:[%s3934_s4 + $0x6c] sm:$0xf0] }
 0x6a1   : > { %v1527_v20 = vpop.f32.mrf.mxu3 }
 0x6a2   : > { %v1532_v15 = vadd.f32 %v1527_v20, %v1384_v2  ;;  %v3306_v2 = vor.u32 %v3552_v0, %v3305_v63  ;;  %v3543_v20 = vld [vmem:[%s3934_s4 + $0xac] sm:$0xf0]  ;;  %v3532_v63 = vld [vmem:[%s3934_s4 + $0x54] sm:$0xf0]  ;;  %v3222_v0 = vor.u32 %v3529_v59, %v3219_v61 }
 0x6a3   : > { %v3266_v22 = vor.u32 %v3543_v20, %v3265_v19  ;;  %v3226_v1 = vor.u32 %v3532_v63, %v3225_v62  ;;  %v3523_v20 = vld [vmem:[%s3934_s4 + $0xc] sm:$0xf0] }
 0x6a5   : > { %v3673_v21 = vpop.eup %3672  ;;  %1948 = vmatpush.bf16.msrb.mxu1 %v3266_v22  ;;  %v3187_v22 = vld [vmem:[%s3934_s4 + $0x10] sm:$0xf0] }
 0x6a6   : > { %v1625_v23 = vpop.f32.mrf.mxu2  ;;  %v1605_v25 = vmul.f32 %v3673_v21, %v3671_v17  ;;  %v3675_v27 = vpop.eup %3674  ;;  %v3291_v17 = vld [vmem:[%s3934_s4 + $0xd8] sm:$0xf0]  ;;  %v3273_v21 = vld [vmem:[%s3934_s4 + $0xa8] sm:$0xf] }
 0x6a7   : > { %v1691_v49 = vmul.f32 128.0, %v3675_v27  ;;  %vm1695_vm10 = vweird.f32 %v3675_v27  ;;  %v3294_v18 = vor.u32 %v3546_v16, %v3291_v17  ;;  %v3211_v16 = vld [vmem:[%s3934_s4 + $0x38] sm:$0xf0]  ;;  %v3185_v17 = vld [vmem:[%s3934_s4] sm:$0xf] }
 0x6a8   : > { %v1607_v29 = vpack.c.bf16 %v1605_v25, %v1605_v25 }
 0x6a9   : > { %v1529_v46 = vpop.f32.mrf.mxu3  ;;  %v1692_v50 = vsub.f32 1.0, %v1691_v49  ;;  %1989 = vmatpush.bf16.msra.mxu0 %v3294_v18 }
 0x6aa   : > { %v1533_v42 = vadd.f32 %v1529_v46, %v1385_v39  ;;  %v3249_v46 = vld [vmem:[%s3934_s4 + $0x80] sm:$0xf] }
 0x6ab   : > { %v1693_v52 = vmul.f32 %v3675_v27, %v1692_v50  ;;  %v3235_v50 = vld [vmem:[%s3934_s4 + $0x70] sm:$0xf0] }
 0x6ad   : > { %v1694_v40 = vadd.f32 %v3675_v27, %v1693_v52  ;;  %v3241_v52 = vld [vmem:[%s3934_s4 + $0x68] sm:$0xf] }
 0x6ae   : > { %v1627_v24 = vpop.f32.mrf.mxu2 }
 0x6af   : > { %v3544_v24 = vld [vmem:[%s3934_s4 + $0xb4] sm:$0xf0] }
 0x6b1   : > { %v1630_v26 = vpop.permute.xlu0 %1629 }
 0x6b2   : > { %v1635_v28 = vsel %vm1149_vm8, %v1630_v26, 0  ;;  %v3274_v26 = vor.u32 %v3544_v24, %v3273_v21  ;;  %v3186_v21 = vor.u32 %v3523_v20, %v3185_v17 }
 0x6b3   : > { %1644 = vmatpush.bf16.msra.mxu3 %v1635_v28  ;;  %v3542_v28 = vld [vmem:[%s3934_s4 + $0xac] sm:$0xf] }
 0x6b6   : > { %3173 = vmatmul.msk.bf16.vlgmr.msra.gmra.mxu3 %vm1119_vm9, %v1607_v29  ;;  %v3275_v29 = vld [vmem:[%s3934_s4 + $0xb8] sm:$0xf0] }
 0x6b7   : > { %1974 = vmatpush.bf16.msrb.mxu3 %v3306_v2  ;;  %v3278_v30 = vor.u32 %v3542_v28, %v3275_v29  ;;  %v3530_v2 = vld [vmem:[%s3934_s4 + $0x4c] sm:$0xf] }
 0x6b8   : > { %v3230_v4 = vor.u32 %v3530_v2, %v3227_v33  ;;  %v3522_v28 = vld [vmem:[%s3934_s4 + $0xc] sm:$0xf] }
 0x6b9   : > { %1990 = vmatpush.bf16.msra.mxu0 %v3278_v30  ;;  %v3195_v30 = vld [vmem:[%s3934_s4 + $0x18] sm:$0xf0] }
 0x6bb   : > { %1975 = vmatpush.bf16.msrb.mxu3 %v3290_v14  ;;  %v3526_v14 = vld [vmem:[%s3934_s4 + $0x2c] sm:$0xf] }
 0x6bc   : > { %v3214_v19 = vor.u32 %v3526_v14, %v3211_v16 }
 0x6bf   : > { %1976 = vmatpush.bf16.msrb.mxu3 %v3274_v26  ;;  %v3524_v26 = vld [vmem:[%s3934_s4 + $0x14] sm:$0xf0] }
 0x739   : > { %v1646_v31 = vpop.f32.mrf.mxu3 }
 0x73a   : > { %v1650_v32 = vpack.c.bf16 %v1646_v31, %v1625_v23  ;;  %v3267_v23 = vld [vmem:[%s3934_s4 + $0xb0] sm:$0xf0]  ;;  %v3539_v31 = vld [vmem:[%s3934_s4 + $0x8c] sm:$0xf0] }
 0x73c   : > { %3182 = vmatmul.msk.bf16.vlgmr.msrb.gmra.mxu0 %vm1070_vm7, %v1650_v32  ;;  %v3537_v32 = vld [vmem:[%s3934_s4 + $0x84] sm:$0xf] }
 0x741   : > { %v1648_v34 = vpop.f32.mrf.mxu3 }
 0x742   : > { %v3250_v34 = vor.u32 %v3539_v31, %v3249_v46  ;;  %v3198_v31 = vor.u32 %v3522_v28, %v3195_v30 }
 0x744   : > { %1949 = vmatpush.bf16.msrb.mxu1 %v3250_v34 }
 0x7b9   : > { %v1675_v35 = vpop.f32.mrf.mxu0 }
 0x7ba   : > { %v1680_v36 = vadd.f32 %v1675_v35, %v1532_v15  ;;  %v3541_v15 = vld [vmem:[%s3934_s4 + $0xa4] sm:$0xf]  ;;  %v3251_v35 = vld [vmem:[%s3934_s4 + $0x90] sm:$0xf0] }
 0x7bb   : > { %v3270_v25 = vor.u32 %v3541_v15, %v3267_v23  ;;  %v3521_v15 = vld [vmem:[%s3934_s4 + $0x4] sm:$0xf] }
 0x7bc   : > { %v1682_v38 = vadd.f32 %v1680_v36, %v4014_v41  ;;  %v4175_v41 = vsel %vm1695_vm10, %v3675_v27, %v1694_v40  ;;  %v3257_v36 = vld [vmem:[%s3934_s4 + $0x88] sm:$0xf]  ;;  %v3533_v27 = vld [vmem:[%s3934_s4 + $0x64] sm:$0xf]  ;;  %v3536_v40 = vld [vmem:[%s3934_s4 + $0x74] sm:$0xf0]  ;;  %v3190_v24 = vor.u32 %v3521_v15, %v3187_v22 }
 0x7bd   : > { %1962 = vmatpush.bf16.msrb.mxu2 %v3270_v25  ;;  %v3258_v39 = vor.u32 %v3540_v37, %v3257_v36  ;;  %v3193_v25 = vld [vmem:[%s3934_s4 + $0x8] sm:$0xf] }
 0x7be   : > { %1686 = vadd.xlane.f32.xlu1 %v1682_v38  ;;  %v3194_v29 = vor.u32 %v3524_v26, %v3193_v25 }
 0x7bf   : > { %1977 = vmatpush.bf16.msrb.mxu3 %v3258_v39 }
 0x7c1   : > { %v1677_v43 = vpop.f32.mrf.mxu0 }
 0x7c2   : > { %v1681_v45 = vadd.f32 %v1677_v43, %v1533_v42  ;;  %v3538_v42 = vld [vmem:[%s3934_s4 + $0x8c] sm:$0xf]  ;;  %v3259_v43 = vld [vmem:[%s3934_s4 + $0x98] sm:$0xf0] }
 0x7c4   : > { %v1683_v47 = vadd.f32 %v1681_v45, %v4016_v44  ;;  %v3262_v45 = vor.u32 %v3538_v42, %v3259_v43 }
 0x7c6   : > { %1688 = vadd.xlane.f32.xlu1 %v1683_v47  ;;  %1991 = vmatpush.bf16.msra.mxu0 %v3262_v45 }
 0x831   : > { %v1687_v54 = vpop.xlane.xlu1 %1686 }
 0x832   : > { %v1697_v44 = vmul.f32 %v4175_v41, %v1687_v54  ;;  %v3238_v54 = vor.u32 %v3533_v27, %v3235_v50 }
 0x834   : > { %v4178_v55 = vsub.f32 %v1682_v38, %v1697_v44  ;;  %v3254_v38 = vor.u32 %v3537_v32, %v3251_v35  ;;  %v3242_v44 = vor.u32 %v3536_v40, %v3241_v52  ;;  %v3637_v40 = vld [vmem:[%s4761_s17] ss:$0 sm:$0xff] }
 0x836   : > { %v1701_v56 = vmul.f32 %v4178_v55, %v4178_v55  ;;  %1963 = vmatpush.bf16.msrb.mxu2 %v3254_v38  ;;  %1978 = vmatpush.bf16.msrb.mxu3 %v3242_v44 }
 0x838   : > { %1703 = vadd.xlane.f32.xlu1 %v1701_v56  ;;  %v3534_v56 = vld [vmem:[%s3934_s4 + $0x6c] sm:$0xf] }
 0x839   : > { %v1689_v3 = vpop.xlane.xlu1 %1688 }
 0x83a   : > { %v1698_v51 = vmul.f32 %v4175_v41, %v1689_v3  ;;  %v3243_v3 = vld [vmem:[%s3934_s4 + $0x78] sm:$0xf0]  ;;  %1964 = vmatpush.bf16.msrb.mxu2 %v3238_v54  ;;  %1979 = vmatpush.bf16.msrb.mxu3 %v3226_v1 }
 0x83c   : > { %v4183_v57 = vsub.f32 %v1683_v47, %v1698_v51  ;;  %v3233_v47 = vld [vmem:[%s3934_s4 + $0x60] sm:$0xf]  ;;  %v3246_v51 = vor.u32 %v3534_v56, %v3243_v3 }
 0x83d   : > { %v3234_v49 = vor.u32 %v3535_v48, %v3233_v47 }
 0x83e   : > { %v1702_v10 = vmul.f32 %v4183_v57, %v4183_v57  ;;  %1992 = vmatpush.bf16.msra.mxu0 %v3246_v51  ;;  %1965 = vmatpush.bf16.msrb.mxu2 %v3222_v0  ;;  %v3638_v51 = vld [vmem:[%s4762_s26] ss:$0 sm:$0xff] }
 0x83f   : > { %1950 = vmatpush.bf16.msrb.mxu1 %v3234_v49  ;;  %1980 = vmatpush.bf16.msrb.mxu3 %v3210_v13 }
 0x840   : > { %1705 = vadd.xlane.f32.xlu0 %v1702_v10  ;;  %v3217_v10 = vld [vmem:[%s3934_s4 + $0x40] sm:$0xf] }
 0x841   : > { %v3218_v60 = vor.u32 %v3531_v58, %v3217_v10 }
 0x842   : > { %1993 = vmatpush.bf16.msra.mxu0 %v3230_v4  ;;  %1966 = vmatpush.bf16.msrb.mxu2 %v3206_v12 }
 0x843   : > { %1951 = vmatpush.bf16.msrb.mxu1 %v3218_v60  ;;  %1981 = vmatpush.bf16.msrb.mxu3 %v3194_v29  ;;  %v4272_v60 = vld [vmem:[%s3940_s19] sm:$0xf] }
 0x844   : > { %v1781_v61 = vperm.slane %v4272_v60, 3  ;;  %v1779_v33 = vperm.slane %v4272_v60, 1  ;;  %v1780_v16 = vperm.slane %v4272_v60, 2 }
 0x846   : > { %1994 = vmatpush.bf16.msra.mxu0 %v3214_v19  ;;  %1967 = vmatpush.bf16.msrb.mxu2 %v3190_v24 }
 0x847   : > { %1952 = vmatpush.bf16.msrb.mxu1 %v3202_v8 }
 0x84a   : > { %1995 = vmatpush.bf16.msra.mxu0 %v3198_v31 }
 0x84b   : > { %1953 = vmatpush.bf16.msrb.mxu1 %v3186_v21 }
 0x8ab   : > { %v1704_v18 = vpop.xlane.xlu1 %1703 }
 0x8ac   : > { %v1707_v23 = vmul.f32 %v1704_v18, %v4175_v41 }
 0x8ae   : > { %v1709_v46 = vadd.f32 1e-12, %v1707_v23 }
 0x8b0   : > { %3676 = vrsqrt.f32 %v1709_v46  ;;  %vm1717_vm12 = vweird.f32 %v1709_v46 }
 0x8b3   : > { %v1706_v32 = vpop.xlane.xlu0 %1705 }
 0x8b4   : > { %v1708_v34 = vmul.f32 %v1706_v32, %v4175_v41 }
 0x8b6   : > { %v3677_v35 = vpop.eup %3676  ;;  %v1710_v36 = vadd.f32 1e-12, %v1708_v34 }
 0x8b7   : > { %v1712_v37 = vmul.f32 %v3677_v35, %v1709_v46  ;;  %vm1718_vm11 = vweird.f32 %v3677_v35 }
 0x8b8   : > { %3678 = vrsqrt.f32 %v1710_v36  ;;  %vm1719_vm13 = vmor %vm1717_vm12, %vm1718_vm11  ;;  %vm1727_vm15 = vweird.f32 %v1710_v36 }
 0x8b9   : > { %v1713_v38 = vmul.f32 %v3677_v35, %v1712_v37 }
 0x8bb   : > { %v1714_v39 = vmul.f32 0.5, %v1713_v38 }
 0x8bd   : > { %v1715_v42 = vsub.f32 1.5, %v1714_v39 }
 0x8be   : > { %v3679_v43 = vpop.eup %3678 }
 0x8bf   : > { %v1716_v45 = vmul.f32 %v3677_v35, %v1715_v42  ;;  %v1722_v47 = vmul.f32 %v3679_v43, %v1710_v36  ;;  %vm1728_vm14 = vweird.f32 %v3679_v43 }
 0x8c0   : > { %vm1729_vm0 = vmor %vm1727_vm15, %vm1728_vm14 }
 0x8c1   : > { %v1723_v48 = vmul.f32 %v3679_v43, %v1722_v47  ;;  %v1720_v27 = vsel %vm1719_vm13, %v3677_v35, %v1716_v45 }
 0x8c2   : > { %v1731_v52 = vmul.f32 %v1720_v27, %v4178_v55 }
 0x8c3   : > { %v1724_v49 = vmul.f32 0.5, %v1723_v48 }
 0x8c4   : > { %v1736_v3 = vmul.f32 %v3637_v40, %v1731_v52 }
 0x8c5   : > { %v1725_v50 = vsub.f32 1.5, %v1724_v49 }
 0x8c6   : > { %v4265_v55 = vadd.f32 %v3638_v51, %v1736_v3 }
 0x8c7   : > { %v1726_v54 = vmul.f32 %v3679_v43, %v1725_v50 }
 0x8c9   : > { %v1730_v44 = vsel %vm1729_vm0, %v3679_v43, %v1726_v54 }
 0x8ca   : > { %v1732_v56 = vmul.f32 %v1730_v44, %v4183_v57  ;;  %v1778_v57 = vperm.slane %v4272_v60, 0 }
 0x8cc   : > { %v1737_v10 = vmul.f32 %v3637_v40, %v1732_v56 }
 0x8ce   : > { %v4267_v58 = vadd.f32 %v3638_v51, %v1737_v10 }
 0x8d0   : > { %v1775_v59 = vpack.c.bf16 %v4267_v58, %v4265_v55 }
 0x8d2   : > { %1954 = vmatmul.bf16.vlgmr.msrb.gmra.mxu1 %v1775_v59  ;;  %1968 = vmatmul.bf16.vlgmr.msrb.gmra.mxu2 %v1775_v59 }
 0x8d3   : > { %1982 = vmatmul.bf16.vlgmr.msrb.gmra.mxu3 %v1775_v59  ;;  %1996 = vmatmul.bf16.vlgmr.msra.gmra.mxu0 %v1775_v59 }
 0x94f   : > { %v1955_v62 = vpop.f32.mrf.mxu1 }
 0x950   : > { %v4276_v63 = vadd.f32 %v1955_v62, %v1778_v57  ;;  %v1997_v0 = vpop.f32.mrf.mxu0 }
 0x951   : > { %v4278_v1 = vadd.f32 %v1997_v0, %v1781_v61 }
 0x952   : > { %v4281_v2 = vmul.f32 0.70710677, %v4276_v63 }
 0x953   : > { %v4285_v4 = vmul.f32 0.70710677, %v4278_v1 }
 0x954   : > { %v2018_v5 = vmul.f32 %v4281_v2, %v4281_v2 }
 0x955   : > { %v2138_v6 = vmul.f32 %v4285_v4, %v4285_v4  ;;  %v1969_v7 = vpop.f32.mrf.mxu2 }
 0x956   : > { %v4291_v8 = vmin.f32 %v2018_v5, 16.0  ;;  %v4295_v53 = vadd.f32 %v1969_v7, %v1779_v33  ;;  %v1983_v18 = vpop.f32.mrf.mxu3 }
 0x957   : > { %v4297_v9 = vmin.f32 %v2138_v6, 16.0  ;;  %v4315_v25 = vadd.f32 %v1983_v18, %v1780_v16  ;;  %v1957_v26 = vpop.f32.mrf.mxu1 }
 0x958   : > { %v2020_v11 = vmul.f32 2.1237322e-06, %v4291_v8  ;;  %v2031_v12 = vmul.f32 3.8918573e-05, %v4291_v8  ;;  %v4303_v14 = vmul.f32 0.70710677, %v4295_v53  ;;  %v4319_v32 = vadd.f32 %v1957_v26, %v1778_v57  ;;  %v1999_v44 = vpop.f32.mrf.mxu0 }
 0x959   : > { %v2151_v13 = vmul.f32 3.8918573e-05, %v4297_v9  ;;  %v2140_v19 = vmul.f32 2.1237322e-06, %v4297_v9  ;;  %v4324_v36 = vmul.f32 0.70710677, %v4315_v25  ;;  %v4343_v57 = vadd.f32 %v1999_v44, %v1781_v61 }
 0x95a   : > { %v2032_v17 = vadd.f32 0.001143296, %v2031_v12  ;;  %v2058_v15 = vmul.f32 %v4303_v14, %v4303_v14  ;;  %v2021_v22 = vadd.f32 0.00028619796, %v2020_v11  ;;  %v4329_v45 = vmul.f32 0.70710677, %v4319_v32 }
 0x95b   : > { %v2152_v20 = vadd.f32 0.001143296, %v2151_v13  ;;  %v2141_v29 = vadd.f32 0.00028619796, %v2140_v19  ;;  %v2098_v27 = vmul.f32 %v4324_v36, %v4324_v36 }
 0x95c   : > { %v2033_v23 = vmul.f32 %v2032_v17, %v4291_v8  ;;  %v4311_v24 = vmin.f32 %v2058_v15, 16.0  ;;  %v2022_v46 = vmul.f32 %v2021_v22, %v4291_v8  ;;  %v2178_v54 = vmul.f32 %v4329_v45, %v4329_v45 }
 0x95d   : > { %v2153_v21 = vmul.f32 %v2152_v20, %v4297_v9  ;;  %v2142_v38 = vmul.f32 %v2141_v29, %v4297_v9  ;;  %v4340_v10 = vmin.f32 %v2098_v27, 16.0  ;;  %v4352_v17 = vmul.f32 0.70710677, %v4343_v57 }
 0x95e   : > { %v2034_v28 = vadd.f32 0.014752088, %v2033_v23  ;;  %v2071_v35 = vmul.f32 3.8918573e-05, %v4311_v24  ;;  %v2023_v42 = vadd.f32 0.0036580483, %v2022_v46 }
 0x95f   : > { %v2154_v30 = vadd.f32 0.014752088, %v2153_v21  ;;  %v2143_v50 = vadd.f32 0.0036580483, %v2142_v38  ;;  %v2060_v40 = vmul.f32 2.1237322e-06, %v4311_v24 }
 0x960   : > { %v2035_v31 = vmul.f32 %v2034_v28, %v4291_v8  ;;  %v2072_v48 = vadd.f32 0.001143296, %v2071_v35  ;;  %v2024_v52 = vmul.f32 %v2023_v42, %v4291_v8  ;;  %v4345_v5 = vmin.f32 %v2178_v54, 16.0 }
 0x961   : > { %v2155_v34 = vmul.f32 %v2154_v30, %v4297_v9  ;;  %v2144_v59 = vmul.f32 %v2143_v50, %v4297_v9  ;;  %v2061_v0 = vadd.f32 0.00028619796, %v2060_v40  ;;  %v2111_v12 = vmul.f32 3.8918573e-05, %v4340_v10 }
 0x962   : > { %v2036_v37 = vadd.f32 0.112945676, %v2035_v31  ;;  %v2073_v51 = vmul.f32 %v2072_v48, %v4311_v24  ;;  %v2025_v62 = vadd.f32 0.05243302, %v2024_v52  ;;  %v2100_v19 = vmul.f32 2.1237322e-06, %v4340_v10 }
 0x963   : > { %v2156_v39 = vadd.f32 0.112945676, %v2155_v34  ;;  %v2145_v13 = vadd.f32 0.05243302, %v2144_v59  ;;  %v2062_v61 = vmul.f32 %v2061_v0, %v4311_v24  ;;  %v2180_v20 = vmul.f32 2.1237322e-06, %v4345_v5  ;;  %v1971_v0 = vpop.f32.mrf.mxu2 }
 0x964   : > { %v2037_v43 = vmul.f32 %v2036_v37, %v4291_v8  ;;  %v2074_v11 = vadd.f32 0.014752088, %v2073_v51  ;;  %v2026_v18 = vmul.f32 %v2025_v62, %v4291_v8  ;;  %v2112_v23 = vadd.f32 0.001143296, %v2111_v12 }
 0x965   : > { %v2157_v47 = vmul.f32 %v2156_v39, %v4297_v9  ;;  %v2191_v21 = vmul.f32 3.8918573e-05, %v4345_v5  ;;  %v2181_v26 = vadd.f32 0.00028619796, %v2180_v20  ;;  %v2298_v28 = vmul.f32 %v4352_v17, %v4352_v17 }
 0x966   : > { %v2038_v49 = vadd.f32 0.4994258, %v2037_v43  ;;  %v2075_v22 = vmul.f32 %v2074_v11, %v4311_v24  ;;  %v2146_v29 = vmul.f32 %v2145_v13, %v4297_v9  ;;  %v2063_v30 = vadd.f32 0.0036580483, %v2062_v61 }
 0x967   : > { %v2158_v3 = vadd.f32 0.4994258, %v2157_v47  ;;  %v2101_v46 = vadd.f32 0.00028619796, %v2100_v19  ;;  %v2027_v31 = vadd.f32 0.18741608, %v2026_v18  ;;  %v2113_v35 = vmul.f32 %v2112_v23, %v4340_v10 }
 0x968   : > { %v2039_v56 = vmul.f32 %v2038_v49, %v4291_v8  ;;  %v2076_v34 = vadd.f32 0.112945676, %v2075_v22  ;;  %v2192_v37 = vadd.f32 0.001143296, %v2191_v21  ;;  %v2182_v39 = vmul.f32 %v2181_v26, %v4345_v5 }
 0x969   : > { %v2159_v7 = vmul.f32 %v2158_v3, %v4297_v9  ;;  %v4371_v42 = vmin.f32 %v2298_v28, 16.0  ;;  %v2147_v43 = vadd.f32 0.18741608, %v2146_v29  ;;  %v2064_v47 = vmul.f32 %v2063_v30, %v4311_v24 }
 0x96a   : > { %v4347_v6 = vadd.f32 1.0, %v2039_v56  ;;  %v2102_v48 = vmul.f32 %v2101_v46, %v4340_v10  ;;  %v2028_v27 = vmul.f32 %v2027_v31, %v4291_v8  ;;  %v2077_v49 = vmul.f32 %v2076_v34, %v4311_v24 }
 0x96b   : > { %v4359_v15 = vadd.f32 1.0, %v2159_v7  ;;  %v2114_v50 = vadd.f32 0.014752088, %v2113_v35  ;;  %v2193_v52 = vmul.f32 %v2192_v37, %v4345_v5  ;;  %v2183_v44 = vadd.f32 0.0036580483, %v2182_v39  ;;  %v3560_v35 = vld [vmem:[%s3945_s16 + $0x38] sm:$0xff] }
 0x96c   : > { %3680 = vrcp.f32 %v4347_v6  ;;  %v2300_v3 = vmul.f32 2.1237322e-06, %v4371_v42  ;;  %v2148_v51 = vmul.f32 %v2147_v43, %v4297_v9  ;;  %v2065_v59 = vadd.f32 0.05243302, %v2064_v47  ;;  %v3584_v37 = vld [vmem:[%s3945_s16 + $0xf8] sm:$0xff]  ;;  %2618 = vmatpush.bf16.msra.mxu1 %v3560_v35 }
 0x96d   : > { %3682 = vrcp.f32 %v4359_v15  ;;  %v2194_v56 = vadd.f32 0.014752088, %v2193_v52  ;;  %v2103_v62 = vadd.f32 0.0036580483, %v2102_v48  ;;  %v2029_v8 = vadd.f32 1.1283791, %v2028_v27  ;;  %2660 = vmatpush.bf16.msrb.mxu0 %v3584_v37 }
 0x96e   : > { %v2078_v7 = vadd.f32 0.4994258, %v2077_v49  ;;  %v2115_v11 = vmul.f32 %v2114_v50, %v4340_v10  ;;  %v4387_v13 = vmul.f32 0.5, %v4276_v63  ;;  %v4392_v19 = vmul.f32 0.5, %v4319_v32 }
 0x96f   : > { %v2195_v12 = vmul.f32 %v2194_v56, %v4345_v5  ;;  %v2184_v9 = vmul.f32 %v2183_v44, %v4345_v5  ;;  %v2301_v20 = vadd.f32 0.00028619796, %v2300_v3  ;;  %v2311_v22 = vmul.f32 3.8918573e-05, %v4371_v42 }
 0x970   : > { %v4398_v23 = vadd.f32 %v1971_v0, %v1779_v33  ;;  %v2149_v63 = vadd.f32 1.1283791, %v2148_v51  ;;  %v2066_v21 = vmul.f32 %v2065_v59, %v4311_v24  ;;  %v2104_v26 = vmul.f32 %v2103_v62, %v4340_v10  ;;  %v3559_v62 = vld [vmem:[%s3945_s16 + $0x30] sm:$0xff] }
 0x971   : > { %v2196_v28 = vadd.f32 0.112945676, %v2195_v12  ;;  %v4403_v32 = vmul.f32 %v2029_v8, %v4281_v2  ;;  %v2050_v29 = vand.u32 2147483647, %v4347_v6  ;;  %v2079_v30 = vmul.f32 %v2078_v7, %v4311_v24  ;;  %v3583_v0 = vld [vmem:[%s3945_s16 + $0xf0] sm:$0xff]  ;;  %2619 = vmatpush.bf16.msra.mxu1 %v3559_v62  ;;  %v3581_v62 = vld [vmem:[%s3945_s16 + $0xe0] sm:$0xff] }
 0x972   : > { %v4368_v38 = vpop.eup %3680  ;;  %v2116_v46 = vadd.f32 0.112945676, %v2115_v11  ;;  %vm2046_vm1 = vweird.f32 %v4347_v6  ;;  %v2185_v39 = vadd.f32 0.05243302, %v2184_v9  ;;  %v2302_v43 = vmul.f32 %v2301_v20, %v4371_v42  ;;  %2661 = vmatpush.bf16.msrb.mxu0 %v3583_v0  ;;  %v3568_v20 = vld [vmem:[%s3945_s16 + $0x78] sm:$0xff] }
 0x973   : > { %v2042_v40 = vmul.f32 %v4368_v38, %v4347_v6  ;;  %v4380_v54 = vpop.eup %3682  ;;  %v2197_v34 = vmul.f32 %v2196_v28, %v4345_v5  ;;  %v2312_v47 = vadd.f32 0.001143296, %v2311_v22  ;;  %v4414_v2 = vmul.f32 0.70710677, %v4398_v23  ;;  %v3576_v22 = vld [vmem:[%s3945_s16 + $0xb8] sm:$0xff]  ;;  %2632 = vmatpush.bf16.msra.mxu2 %v3568_v20 }
 0x974   : > { %v2162_v61 = vmul.f32 %v4380_v54, %v4359_v15  ;;  %v2052_v48 = vand.u32 2147483648, %v4347_v6  ;;  %v4418_v27 = vmul.f32 %v2149_v63, %v4285_v4  ;;  %v2170_v49 = vand.u32 2147483647, %v4359_v15  ;;  %2646 = vmatpush.bf16.msra.mxu3 %v3576_v22  ;;  %v3574_v22 = vld [vmem:[%s3945_s16 + $0xa8] sm:$0xff] }
 0x975   : > { %v2043_v18 = vsub.f32 1.0, %v2042_v40  ;;  %v2198_v50 = vadd.f32 0.4994258, %v2197_v34  ;;  %vm4421_vm2 = vcmp.eq.f32.partialorder %v2050_v29, 8.507059e+37  ;;  %v2172_v40 = vand.u32 2147483648, %v4359_v15  ;;  %v3582_v34 = vld [vmem:[%s3945_s16 + $0xe8] sm:$0xff] }
 0x976   : > { %v2163_v33 = vsub.f32 1.0, %v2162_v61  ;;  %v4426_v44 = vadd.f32 1.0, %v2079_v30  ;;  %v2117_v56 = vmul.f32 %v2116_v46, %v4340_v10  ;;  %v2313_v3 = vmul.f32 %v2312_v47, %v4371_v42  ;;  %v1985_v30 = vpop.f32.mrf.mxu3  ;;  %2662 = vmatpush.bf16.msrb.mxu0 %v3582_v34  ;;  %v3580_v34 = vld [vmem:[%s3945_s16 + $0xd8] sm:$0xff] }
 0x977   : > { %v2044_v31 = vmul.f32 %v4368_v38, %v2043_v18  ;;  %vm2047_vm3 = vweird.f32 %v4368_v38  ;;  %v2199_v51 = vmul.f32 %v2198_v50, %v4345_v5  ;;  %v2218_v59 = vmul.f32 %v4414_v2, %v4414_v2 }
 0x978   : > { %v2164_v4 = vmul.f32 %v4380_v54, %v2163_v33  ;;  %v2186_v7 = vmul.f32 %v2185_v39, %v4345_v5  ;;  %v2303_v11 = vadd.f32 0.0036580483, %v2302_v43  ;;  %v2314_v12 = vadd.f32 0.014752088, %v2313_v3  ;;  %vm4452_vm5 = vmor %vm2046_vm1, %vm2047_vm3  ;;  %v3558_v33 = vld [vmem:[%s3945_s16 + $0x28] sm:$0xff]  ;;  %v3575_v3 = vld [vmem:[%s3945_s16 + $0xb0] sm:$0xff] }
 0x979   : > { %v2045_v8 = vadd.f32 %v4368_v38, %v2044_v31  ;;  %vm2166_vm4 = vweird.f32 %v4359_v15  ;;  %v2067_v18 = vadd.f32 0.18741608, %v2066_v21  ;;  %v4440_v61 = vadd.f32 1.0, %v2199_v51  ;;  %2620 = vmatpush.bf16.msra.mxu1 %v3558_v33  ;;  %2647 = vmatpush.bf16.msra.mxu3 %v3575_v3 }
 0x97a   : > { %v4442_v9 = vmin.f32 %v2218_v59, 16.0  ;;  %v2053_v63 = vor.u32 1.1754944e-38, %v2052_v48  ;;  %3684 = vrcp.f32 %v4426_v44  ;;  %v2118_v28 = vadd.f32 0.4994258, %v2117_v56  ;;  %v3567_v56 = vld [vmem:[%s3945_s16 + $0x70] sm:$0xff]  ;;  %2663 = vmatpush.bf16.msrb.mxu0 %v3581_v62 }
 0x97b   : > { %v2315_v29 = vmul.f32 %v2314_v12, %v4371_v42  ;;  %v2165_v46 = vadd.f32 %v4380_v54, %v2164_v4  ;;  %vm2167_vm6 = vweird.f32 %v4380_v54  ;;  %v2105_v31 = vadd.f32 0.05243302, %v2104_v26  ;;  %2633 = vmatpush.bf16.msra.mxu2 %v3567_v56 }
 0x97c   : > { %3686 = vrcp.f32 %v4440_v61  ;;  %v2049_v6 = vsel %vm4452_vm5, %v4368_v38, %v2045_v8  ;;  %v2187_v35 = vadd.f32 0.18741608, %v2186_v7  ;;  %v2304_v37 = vmul.f32 %v2303_v11, %v4371_v42  ;;  %vm4476_vm7 = vmor %vm2166_vm4, %vm2167_vm6 }
 0x97d   : > { %v2316_v39 = vadd.f32 0.112945676, %v2315_v29  ;;  %v2068_v43 = vmul.f32 %v2067_v18, %v4311_v24  ;;  %v2220_v26 = vmul.f32 2.1237322e-06, %v4442_v9  ;;  %v2231_v47 = vmul.f32 3.8918573e-05, %v4442_v9  ;;  %2648 = vmatpush.bf16.msra.mxu3 %v3574_v22 }
 0x97e   : > { %v4470_v48 = vadd.f32 %v1985_v30, %v1780_v16  ;;  %vm4480_vm8 = vcmp.eq.f32.partialorder %v2170_v49, 8.507059e+37  ;;  %v2173_v50 = vor.u32 1.1754944e-38, %v2172_v40  ;;  %v2119_v60 = vmul.f32 %v2118_v28, %v4340_v10  ;;  %v3557_v49 = vld [vmem:[%s3945_s16 + $0x20] sm:$0xff]  ;;  %2664 = vmatpush.bf16.msrb.mxu0 %v3580_v34 }
 0x97f   : > { %v2317_v16 = vmul.f32 %v2316_v39, %v4371_v42  ;;  %v2054_v4 = vsel %vm4421_vm2, %v2053_v63, %v2049_v6  ;;  %v2169_v15 = vsel %vm4476_vm7, %v4380_v54, %v2165_v46  ;;  %v2221_v51 = vadd.f32 0.00028619796, %v2220_v26  ;;  %2621 = vmatpush.bf16.msra.mxu1 %v3557_v49  ;;  %v3565_v24 = vld [vmem:[%s3945_s16 + $0x60] sm:$0xff] }
 0x980   : > { %v2232_v59 = vadd.f32 0.001143296, %v2231_v47  ;;  %v4495_v40 = vpop.eup %3684  ;;  %v4498_v0 = vmul.f32 %v2105_v31, %v4340_v10  ;;  %v2188_v8 = vmul.f32 %v2187_v35, %v4345_v5  ;;  %v2305_v7 = vadd.f32 0.05243302, %v2304_v37  ;;  %v3566_v5 = vld [vmem:[%s3945_s16 + $0x68] sm:$0xff] }
 0x981   : > { %v2318_v52 = vadd.f32 0.4994258, %v2317_v16  ;;  %v4503_v54 = vadd.f32 1.1283791, %v2068_v43  ;;  %v2222_v12 = vmul.f32 %v2221_v51, %v4442_v9  ;;  %v4508_v20 = vmul.f32 0.70710677, %v4470_v48  ;;  %2634 = vmatpush.bf16.msra.mxu2 %v3566_v5 }
 0x982   : > { %v4501_v11 = vpop.eup %3686  ;;  %v2233_v18 = vmul.f32 %v2232_v59, %v4442_v9  ;;  %v2055_v63 = vmul.f32 %v2054_v4, %v4403_v32  ;;  %v4515_v28 = vsel %vm4480_vm8, %v2173_v50, %v2169_v15  ;;  %v4517_v29 = vadd.f32 1.0, %v2119_v60  ;;  %v3556_v32 = vld [vmem:[%s3945_s16 + $0x18] sm:$0xff]  ;;  %v3573_v50 = vld [vmem:[%s3945_s16 + $0xa0] sm:$0xff]  ;;  %v3555_v4 = vld [vmem:[%s3945_s16 + $0x10] sm:$0xff] }
 0x983   : > { %v2202_v30 = vmul.f32 %v4501_v11, %v4440_v61  ;;  %v2082_v21 = vmul.f32 %v4495_v40, %v4426_v44  ;;  %v2319_v46 = vmul.f32 %v2318_v52, %v4371_v42  ;;  %v2258_v33 = vmul.f32 %v4508_v20, %v4508_v20  ;;  %2622 = vmatpush.bf16.msra.mxu1 %v3556_v32  ;;  %v3579_v15 = vld [vmem:[%s3945_s16 + $0xd0] sm:$0xff] }
 0x984   : > { %v2234_v31 = vadd.f32 0.014752088, %v2233_v18  ;;  %v2189_v6 = vadd.f32 1.1283791, %v2188_v8  ;;  %v2212_v37 = vand.u32 2147483648, %v4440_v61  ;;  %v2306_v39 = vmul.f32 %v2305_v7, %v4371_v42  ;;  %2649 = vmatpush.bf16.msra.mxu3 %v3573_v50  ;;  %2665 = vmatpush.bf16.msrb.mxu0 %v3579_v15  ;;  %v3572_v18 = vld [vmem:[%s3945_s16 + $0x98] sm:$0xff] }
 0x985   : > { %v2203_v35 = vsub.f32 1.0, %v2202_v30  ;;  %v4530_v43 = vadd.f32 1.0, %v2319_v46  ;;  %v2223_v26 = vadd.f32 0.0036580483, %v2222_v12  ;;  %v4533_v38 = vmin.f32 %v2258_v33, 16.0  ;;  %2635 = vmatpush.bf16.msra.mxu2 %v3565_v24  ;;  %v3564_v12 = vld [vmem:[%s3945_s16 + $0x58] sm:$0xff] }
 0x986   : > { %v2235_v47 = vmul.f32 %v2234_v31, %v4442_v9  ;;  %3688 = vrcp.f32 %v4517_v29  ;;  %vm2207_vm9 = vweird.f32 %v4501_v11  ;;  %v2210_v16 = vand.u32 2147483647, %v4440_v61  ;;  %v3554_v31 = vld [vmem:[%s3945_s16 + $0x8] sm:$0xff]  ;;  %v3563_v24 = vld [vmem:[%s3945_s16 + $0x50] sm:$0xff] }
 0x987   : > { %v2204_v60 = vmul.f32 %v4501_v11, %v2203_v35  ;;  %v3311_v56 = vclamps-f32 %v2055_v63, 1.0  ;;  %v2083_v3 = vsub.f32 1.0, %v2082_v21  ;;  %vm2206_vm10 = vweird.f32 %v4440_v61  ;;  %2623 = vmatpush.bf16.msra.mxu1 %v3555_v4  ;;  %v3578_v33 = vld [vmem:[%s3945_s16 + $0xc8] sm:$0xff]  ;;  %v3571_v50 = vld [vmem:[%s3945_s16 + $0x90] sm:$0xff] }
 0x988   : > { %3690 = vrcp.f32 %v4530_v43  ;;  %v2307_v59 = vadd.f32 0.18741608, %v2306_v39  ;;  %v2236_v49 = vadd.f32 0.112945676, %v2235_v47  ;;  %v2260_v62 = vmul.f32 2.1237322e-06, %v4533_v38  ;;  %vm2208_vm11 = vmor %vm2206_vm10, %vm2207_vm9  ;;  %2650 = vmatpush.bf16.msra.mxu3 %v3572_v18  ;;  %2666 = vmatpush.bf16.msrb.mxu0 %v3578_v33 }
 0x989   : > { %v2205_v51 = vadd.f32 %v4501_v11, %v2204_v60  ;;  %v2190_v8 = vmul.f32 %v2189_v6, %v4329_v45  ;;  %v2213_v61 = vor.u32 1.1754944e-38, %v2212_v37  ;;  %v2224_v7 = vmul.f32 %v2223_v26, %v4442_v9  ;;  %2636 = vmatpush.bf16.msra.mxu2 %v3564_v12  ;;  %v3570_v12 = vld [vmem:[%s3945_s16 + $0x88] sm:$0xff] }
 0x98a   : > { %v2271_v52 = vmul.f32 3.8918573e-05, %v4533_v38  ;;  %vm2211_vm12 = vcmp.eq.f32.partialorder %v2210_v16, 8.507059e+37  ;;  %v2237_v22 = vmul.f32 %v2236_v49, %v4442_v9  ;;  %v2261_v45 = vadd.f32 0.00028619796, %v2260_v62 }
 0x98b   : > { %v2209_v5 = vsel %vm2208_vm11, %v4501_v11, %v2205_v51  ;;  %v2338_v63 = vadd.f32 1.0, %v3311_v56  ;;  %v2084_v30 = vmul.f32 %v4495_v40, %v2083_v3  ;;  %vm2086_vm13 = vweird.f32 %v4426_v44  ;;  %2624 = vmatpush.bf16.msra.mxu1 %v3554_v31  ;;  %v3553_v51 = vld [vmem:[%s3945_s16] sm:$0xff] }
 0x98c   : > { %v2214_v21 = vsel %vm2211_vm12, %v2213_v61, %v2209_v5  ;;  %v2272_v46 = vadd.f32 0.001143296, %v2271_v52  ;;  %v4559_v32 = vpop.eup %3688  ;;  %v2308_v11 = vmul.f32 %v2307_v59, %v4371_v42  ;;  %v2238_v6 = vadd.f32 0.4994258, %v2237_v22  ;;  %v3577_v59 = vld [vmem:[%s3945_s16 + $0xc0] sm:$0xff]  ;;  %2651 = vmatpush.bf16.msra.mxu3 %v3571_v50  ;;  %v3562_v52 = vld [vmem:[%s3945_s16 + $0x48] sm:$0xff] }
 0x98d   : > { %v2215_v34 = vmul.f32 %v2214_v21, %v2190_v8  ;;  %v2090_v37 = vand.u32 2147483647, %v4426_v44  ;;  %v2225_v39 = vadd.f32 0.05243302, %v2224_v7  ;;  %v2262_v26 = vmul.f32 %v2261_v45, %v4533_v38  ;;  %2637 = vmatpush.bf16.msra.mxu2 %v3563_v24  ;;  %2667 = vmatpush.bf16.msrb.mxu0 %v3577_v59 }
 0x98e   : > { %v4563_v35 = vpop.eup %3690  ;;  %v2273_v47 = vmul.f32 %v2272_v46, %v4533_v38  ;;  %v2175_v42 = vmul.f32 %v4515_v28, %v4418_v27  ;;  %vm2087_vm14 = vweird.f32 %v4495_v40  ;;  %v2346_v56 = vmul.f32 %v2338_v63, %v4387_v13 }
 0x98f   : > { %v3315_v60 = vclamps-f32 %v2215_v34, 1.0  ;;  %v2322_v16 = vmul.f32 %v4563_v35, %v4530_v43  ;;  %v2085_v3 = vadd.f32 %v4495_v40, %v2084_v30  ;;  %v2239_v4 = vmul.f32 %v2238_v6, %v4442_v9  ;;  %2625 = vmatpush.bf16.msra.mxu1 %v3553_v51  ;;  %vm4599_vm0 = vmor %vm2086_vm13, %vm2087_vm14 }
 0x990   : > { %v2274_v15 = vadd.f32 0.014752088, %v2273_v47  ;;  %v2309_v62 = vadd.f32 1.1283791, %v2308_v11  ;;  %v2332_v28 = vand.u32 2147483648, %v4530_v43  ;;  %v2226_v8 = vmul.f32 %v2225_v39, %v4442_v9  ;;  %2652 = vmatpush.bf16.msra.mxu3 %v3570_v12  ;;  %v3561_v39 = vld [vmem:[%s3945_s16 + $0x40] sm:$0xff] }
 0x991   : > { %v2342_v49 = vadd.f32 1.0, %v3315_v60  ;;  %v2323_v27 = vsub.f32 1.0, %v2322_v16  ;;  %v4582_v61 = vadd.f32 1.0, %v2239_v4  ;;  %v2263_v13 = vadd.f32 0.0036580483, %v2262_v26  ;;  %2638 = vmatpush.bf16.msra.mxu2 %v3562_v52  ;;  %v3569_v26 = vld [vmem:[%s3945_s16 + $0x80] sm:$0xff] }
 0x992   : > { %v2275_v7 = vmul.f32 %v2274_v15, %v4533_v38  ;;  %vm2327_vm15 = vweird.f32 %v4563_v35  ;;  %v2330_v22 = vand.u32 2147483647, %v4530_v43  ;;  %v3314_v45 = vclamps-f32 %v2175_v42, 1.0 }
 0x993   : > { %v2350_v18 = vmul.f32 %v2342_v49, %v4392_v19  ;;  %v2324_v5 = vmul.f32 %v4563_v35, %v2323_v27  ;;  %v2092_v63 = vand.u32 2147483648, %v4426_v44  ;;  %v2122_v30 = vmul.f32 %v4559_v32, %v4517_v29 }
 0x994   : > { %3692 = vrcp.f32 %v4582_v61  ;;  %vm2326_vm1 = vweird.f32 %v4530_v43  ;;  %v2276_v31 = vadd.f32 0.112945676, %v2275_v7  ;;  %v2089_v33 = vsel %vm4599_vm0, %v4495_v40, %v2085_v3  ;;  %2653 = vmatpush.bf16.msra.mxu3 %v3569_v26 }
 0x995   : > { %v2418_v21 = vpack.c.bf16 %v2350_v18, %v2346_v56  ;;  %v2325_v46 = vadd.f32 %v4563_v35, %v2324_v5  ;;  %vm2328_vm2 = vmor %vm2326_vm1, %vm2327_vm15  ;;  %v2333_v34 = vor.u32 1.1754944e-38, %v2332_v28  ;;  %v2227_v11 = vadd.f32 0.18741608, %v2226_v8  ;;  %2639 = vmatpush.bf16.msra.mxu2 %v3561_v39 }
 0x996   : > { %v2264_v6 = vmul.f32 %v2263_v13, %v4533_v38  ;;  %v2310_v47 = vmul.f32 %v2309_v62, %v4352_v17  ;;  %vm2331_vm3 = vcmp.eq.f32.partialorder %v2330_v22, 8.507059e+37  ;;  %v2277_v43 = vmul.f32 %v2276_v31, %v4533_v38 }
 0x997   : > { %v2329_v24 = vsel %vm2328_vm2, %v4563_v35, %v2325_v46  ;;  %2626 = vmatmul.bf16.vlgmr.msra.gmra.mxu1 %v2418_v21  ;;  %v2093_v50 = vor.u32 1.1754944e-38, %v2092_v63  ;;  %v2107_v42 = vadd.f32 0.18741608, %v4498_v0  ;;  %v2123_v60 = vsub.f32 1.0, %v2122_v30 }
 0x998   : > { %v2334_v40 = vsel %vm2331_vm3, %v2333_v34, %v2329_v24  ;;  %v2341_v16 = vadd.f32 1.0, %v3314_v45  ;;  %vm2091_vm4 = vcmp.eq.f32.partialorder %v2090_v37, 8.507059e+37  ;;  %v2278_v3 = vadd.f32 0.4994258, %v2277_v43 }
 0x999   : > { %v2335_v56 = vmul.f32 %v2334_v40, %v2310_v47  ;;  %v2094_v4 = vsel %vm2091_vm4, %v2093_v50, %v2089_v33  ;;  %v2228_v35 = vmul.f32 %v2227_v11, %v4442_v9  ;;  %v2265_v15 = vadd.f32 0.05243302, %v2264_v6 }
 0x99a   : > { %v3693_v17 = vpop.eup %3692  ;;  %v2005_v51 = vmul.f32 0.5, %v4278_v1  ;;  %v2070_v0 = vmul.f32 %v4503_v54, %v4303_v14  ;;  %v2108_v44 = vmul.f32 %v2107_v42, %v4340_v10  ;;  %v2124_v37 = vmul.f32 %v4559_v32, %v2123_v60 }
 0x99b   : > { %v3318_v59 = vclamps-f32 %v2335_v56, 1.0  ;;  %v2242_v49 = vmul.f32 %v3693_v17, %v4582_v61  ;;  %v2009_v62 = vmul.f32 0.5, %v4343_v57  ;;  %v2279_v27 = vmul.f32 %v2278_v3, %v4533_v38 }
 0x99c   : > { %v2349_v28 = vmul.f32 %v2341_v16, %v2005_v51  ;;  %v2095_v8 = vmul.f32 %v2094_v4, %v2070_v0  ;;  %v2229_v7 = vadd.f32 1.1283791, %v2228_v35  ;;  %v2252_v1 = vand.u32 2147483648, %v4582_v61 }
 0x99d   : > { %v2345_v9 = vadd.f32 1.0, %v3318_v59  ;;  %v2243_v13 = vsub.f32 1.0, %v2242_v49  ;;  %v2266_v14 = vmul.f32 %v2265_v15, %v4533_v38  ;;  %v2280_v54 = vadd.f32 1.0, %v2279_v27 }
 0x99e   : > { %vm2247_vm5 = vweird.f32 %v3693_v17  ;;  %v2250_v10 = vand.u32 2147483647, %v4582_v61  ;;  %v2125_v18 = vadd.f32 %v4559_v32, %v2124_v37  ;;  %vm2126_vm6 = vweird.f32 %v4517_v29 }
 0x99f   : > { %v2353_v52 = vmul.f32 %v2345_v9, %v2009_v62  ;;  %v2244_v12 = vmul.f32 %v3693_v17, %v2243_v13  ;;  %vm2127_vm7 = vweird.f32 %v4559_v32  ;;  %3694 = vrcp.f32 %v2280_v54 }
 0x9a0   : > { %v2132_v57 = vand.u32 2147483648, %v4517_v29  ;;  %vm2246_vm8 = vweird.f32 %v4582_v61  ;;  %v3312_v45 = vclamps-f32 %v2095_v8, 1.0  ;;  %v2130_v63 = vand.u32 2147483647, %v4517_v29  ;;  %vm2128_vm10 = vmor %vm2126_vm6, %vm2127_vm7 }
 0x9a1   : > { %v2421_v5 = vpack.c.bf16 %v2353_v52, %v2349_v28  ;;  %v2245_v22 = vadd.f32 %v3693_v17, %v2244_v12  ;;  %vm2248_vm9 = vmor %vm2246_vm8, %vm2247_vm5  ;;  %v2253_v30 = vor.u32 1.1754944e-38, %v2252_v1  ;;  %v2267_v19 = vadd.f32 0.18741608, %v2266_v14 }
 0x9a2   : > { %v2230_v21 = vmul.f32 %v2229_v7, %v4414_v2  ;;  %vm2251_vm11 = vcmp.eq.f32.partialorder %v2250_v10, 8.507059e+37  ;;  %v2109_v31 = vadd.f32 1.1283791, %v2108_v44  ;;  %v2129_v33 = vsel %vm2128_vm10, %v4559_v32, %v2125_v18 }
 0x9a3   : > { %v2249_v46 = vsel %vm2248_vm9, %v3693_v17, %v2245_v22  ;;  %2668 = vmatmul.bf16.vlgmr.msrb.gmra.mxu0 %v2421_v5  ;;  %v2133_v11 = vor.u32 1.1754944e-38, %v2132_v57  ;;  %v2339_v61 = vadd.f32 1.0, %v3312_v45  ;;  %vm2131_vm12 = vcmp.eq.f32.partialorder %v2130_v63, 8.507059e+37 }
 0x9a4   : > { %v2254_v34 = vsel %vm2251_vm11, %v2253_v30, %v2249_v46  ;;  %v2268_v29 = vmul.f32 %v2267_v19, %v4533_v38  ;;  %v2003_v43 = vmul.f32 0.5, %v4295_v53  ;;  %v2110_v2 = vmul.f32 %v2109_v31, %v4324_v36 }
 0x9a5   : > { %v2255_v6 = vmul.f32 %v2254_v34, %v2230_v21  ;;  %v3695_v39 = vpop.eup %3694  ;;  %v2134_v26 = vsel %vm2131_vm12, %v2133_v11, %v2129_v33  ;;  %v2007_v50 = vmul.f32 0.5, %v4398_v23  ;;  %v2292_v56 = vand.u32 2147483648, %v2280_v54 }
 0x9a6   : > { %v2282_v24 = vmul.f32 %v3695_v39, %v2280_v54  ;;  %v2347_v32 = vmul.f32 %v2339_v61, %v2003_v43  ;;  %v2135_v40 = vmul.f32 %v2134_v26, %v2110_v2  ;;  %v2269_v16 = vadd.f32 1.1283791, %v2268_v29 }
 0x9a7   : > { %v3316_v47 = vclamps-f32 %v2255_v6, 1.0  ;;  %vm2287_vm13 = vweird.f32 %v3695_v39  ;;  %v2290_v4 = vand.u32 2147483647, %v2280_v54  ;;  %vm2286_vm14 = vweird.f32 %v2280_v54 }
 0x9a8   : > { %v2283_v60 = vsub.f32 1.0, %v2282_v24  ;;  %vm2288_vm15 = vmor %vm2286_vm14, %vm2287_vm13  ;;  %v2293_v15 = vor.u32 1.1754944e-38, %v2292_v56  ;;  %v3313_v53 = vclamps-f32 %v2135_v40, 1.0  ;;  %v2270_v36 = vmul.f32 %v2269_v16, %v4508_v20  ;;  %v3639_v20 = vld [vmem:[%s759_s23] ss:$0 sm:$0xff] }
 0x9a9   : > { %v2343_v42 = vadd.f32 1.0, %v3316_v47  ;;  %vm2291_vm0 = vcmp.eq.f32.partialorder %v2290_v4, 8.507059e+37  ;;  %v2004_v44 = vmul.f32 0.5, %v4315_v25  ;;  %v2008_v37 = vmul.f32 0.5, %v4470_v48  ;;  %v3640_v40 = vld [vmem:[%s762_s21] ss:$0 sm:$0xff] }
 0x9aa   : > { %v2284_v17 = vmul.f32 %v3695_v39, %v2283_v60  ;;  %v2340_v59 = vadd.f32 1.0, %v3313_v53  ;;  %v3641_v56 = vld [vmem:[%s765_s10] ss:$0 sm:$0xff]  ;;  %s4773_s21 = sld [smem:[#allocation17_spill]] (!%p3447_p5) }
 0x9ab   : > { %v2351_v3 = vmul.f32 %v2343_v42, %v2007_v50 }
 0x9ac   : > { %v2285_v35 = vadd.f32 %v3695_v39, %v2284_v17  ;;  %v2348_v27 = vmul.f32 %v2340_v59, %v2004_v44 }
 0x9ad   : > { %v2419_v38 = vpack.c.bf16 %v2351_v3, %v2347_v32 }
 0x9ae   : > { %v2289_v23 = vsel %vm2288_vm15, %v3695_v39, %v2285_v35 }
 0x9af   : > { %2640 = vmatmul.bf16.vlgmr.msra.gmra.mxu2 %v2419_v38  ;;  %v2294_v51 = vsel %vm2291_vm0, %v2293_v15, %v2289_v23 }
 0x9b0   : > { %v2295_v0 = vmul.f32 %v2294_v51, %v2270_v36 }
 0x9b2   : > { %v3317_v49 = vclamps-f32 %v2295_v0, 1.0 }
 0x9b4   : > { %v2344_v62 = vadd.f32 1.0, %v3317_v49 }
 0x9b6   : > { %v2352_v28 = vmul.f32 %v2344_v62, %v2008_v37 }
 0x9b8   : > { %v2420_v8 = vpack.c.bf16 %v2352_v28, %v2348_v27 }
 0x9ba   : > { %2654 = vmatmul.bf16.vlgmr.msra.gmra.mxu3 %v2420_v8 }
 0xa14   : > { %v2627_v9 = vpop.f32.mrf.mxu1 }
 0xa15   : > { %v2628_v7 = vadd.f32 %v3639_v20, %v2627_v9 }
 0xa1c   : > { %v2629_v14 = vpop.f32.mrf.mxu1 }
 0xa1d   : > { %v2630_v48 = vadd.f32 %v3639_v20, %v2629_v14 }
 0xa20   : > { %v2669_v54 = vpop.f32.mrf.mxu0 }
 0xa28   : > { %v2671_v45 = vpop.f32.mrf.mxu0 }
 0xa32   : > { %v2641_v13 = vpop.f32.mrf.mxu2 }
 0xa33   : > { %v2642_v1 = vadd.f32 %v2641_v13, %v2628_v7 }
 0xa3a   : > { %v2643_v12 = vpop.f32.mrf.mxu2 }
 0xa3b   : > { %v2644_v18 = vadd.f32 %v2643_v12, %v2630_v48 }
 0xa3d   : > { %v2655_v52 = vpop.f32.mrf.mxu3 }
 0xa3e   : > { %v2656_v25 = vadd.f32 %v2655_v52, %v2642_v1 }
 0xa40   : > { %v2670_v10 = vadd.f32 %v2669_v54, %v2656_v25 }
 0xa42   : > { %v2674_v57 = vadd.f32 %v2670_v10, %v4265_v55 }
 0xa44   : > { %2678 = vadd.xlane.f32.xlu2 %v2674_v57 }
 0xa45   : > { %v2657_v5 = vpop.f32.mrf.mxu3 }
 0xa46   : > { %v2658_v22 = vadd.f32 %v2657_v5, %v2644_v18 }
 0xa48   : > { %v2672_v63 = vadd.f32 %v2671_v45, %v2658_v22 }
 0xa4a   : > { %v2675_v30 = vadd.f32 %v2672_v63, %v4267_v58 }
 0xa4c   : > { %2680 = vadd.xlane.f32.xlu1 %v2675_v30 }
 0xab7   : > { %v2679_v19 = vpop.xlane.xlu2 %2678 }
 0xab8   : > { %v2682_v21 = vmul.f32 %v2679_v19, %v4175_v41 }
 0xaba   : > { %v2684_v46 = vsub.f32 %v2674_v57, %v2682_v21 }
 0xabc   : > { %v2686_v31 = vmul.f32 %v2684_v46, %v2684_v46 }
 0xabe   : > { %2688 = vadd.xlane.f32.xlu1 %v2686_v31 }
 0xabf   : > { %v2681_v33 = vpop.xlane.xlu1 %2680 }
 0xac0   : > { %v2683_v34 = vmul.f32 %v2681_v33, %v4175_v41 }
 0xac2   : > { %v2685_v11 = vsub.f32 %v2675_v30, %v2683_v34 }
 0xac4   : > { %v2687_v6 = vmul.f32 %v2685_v11, %v2685_v11 }
 0xac6   : > { %2690 = vadd.xlane.f32.xlu1 %v2687_v6 }
 0xb31   : > { %v2689_v55 = vpop.xlane.xlu1 %2688 }
 0xb32   : > { %v2692_v39 = vmul.f32 %v2689_v55, %v4175_v41 }
 0xb34   : > { %v2694_v61 = vadd.f32 1e-12, %v2692_v39 }
 0xb36   : > { %3696 = vrsqrt.f32 %v2694_v61  ;;  %vm2702_vm2 = vweird.f32 %v2694_v61 }
 0xb39   : > { %v2691_v58 = vpop.xlane.xlu1 %2690 }
 0xb3a   : > { %v2693_v29 = vmul.f32 %v2691_v58, %v4175_v41 }
 0xb3c   : > { %v3697_v26 = vpop.eup %3696  ;;  %v2695_v47 = vadd.f32 1e-12, %v2693_v29 }
 0xb3d   : > { %v2697_v24 = vmul.f32 %v3697_v26, %v2694_v61  ;;  %vm2703_vm1 = vweird.f32 %v3697_v26 }
 0xb3e   : > { %3698 = vrsqrt.f32 %v2695_v47  ;;  %vm2704_vm3 = vmor %vm2702_vm2, %vm2703_vm1  ;;  %vm2712_vm5 = vweird.f32 %v2695_v47 }
 0xb3f   : > { %v2698_v43 = vmul.f32 %v3697_v26, %v2697_v24 }
 0xb41   : > { %v2699_v2 = vmul.f32 0.5, %v2698_v43 }
 0xb43   : > { %v2700_v50 = vsub.f32 1.5, %v2699_v2 }
 0xb44   : > { %v3699_v42 = vpop.eup %3698 }
 0xb45   : > { %v2701_v60 = vmul.f32 %v3697_v26, %v2700_v50  ;;  %v2707_v32 = vmul.f32 %v3699_v42, %v2695_v47  ;;  %vm2713_vm4 = vweird.f32 %v3699_v42 }
 0xb46   : > { %vm2714_vm6 = vmor %vm2712_vm5, %vm2713_vm4 }
 0xb47   : > { %v2705_v41 = vsel %vm2704_vm3, %v3697_v26, %v2701_v60  ;;  %v2708_v16 = vmul.f32 %v3699_v42, %v2707_v32 }
 0xb48   : > { %v2716_v3 = vmul.f32 %v2705_v41, %v2684_v46 }
 0xb49   : > { %v2709_v17 = vmul.f32 0.5, %v2708_v16 }
 0xb4a   : > { %v2721_v4 = vmul.f32 %v3640_v40, %v2716_v3 }
 0xb4b   : > { %v2710_v38 = vsub.f32 1.5, %v2709_v17 }
 0xb4c   : > { %v2726_v35 = vadd.f32 %v3641_v56, %v2721_v4 }
 0xb4d   : > { %v2711_v15 = vmul.f32 %v3699_v42, %v2710_v38 }
 0xb4e   : > { %2728 = vst [vmem:[#allocation2] sm:$0xff] %v2726_v35 }
 0xb4f   : > { %v2715_v53 = vsel %vm2714_vm6, %v3699_v42, %v2711_v15 }
 0xb50   : > { %v2717_v36 = vmul.f32 %v2715_v53, %v2685_v11 }
 0xb52   : > { %v2722_v23 = vmul.f32 %v3640_v40, %v2717_v36  ;;  %2733 = sbr.rel (%p3447_p5) target bundleno = 3073 (0xc01), region = 100 }
 0xb54   : > { %v2727_v51 = vadd.f32 %v3641_v56, %v2722_v23 }
 0xb56   : > { %2729 = vst [vmem:[#allocation2 + $0x8] sm:$0xff] %v2727_v51 }
 0xb57   : > { %v3592_v0 = vld [vmem:[%s4773_s21 + $0x38] sm:$0xff]  ;;  %v3591_v59 = vld [vmem:[%s4773_s21 + $0x30] sm:$0xff]  ;;  %v3590_v49 = vld [vmem:[%s4773_s21 + $0x28] sm:$0xff]  ;;  %v2751_v62 = vpack.c.bf16 %v2727_v51, %v2727_v51  ;;  %v2750_v28 = vpack.c.bf16 %v2726_v35, %v2726_v35  ;;  %vm2761_vm7 = vcmask 1041409  }
 0xb58   : > { %2813 = vmatpush.bf16.msra.mxu0 %v3592_v0  ;;  %v3589_v44 = vld [vmem:[%s4773_s21 + $0x20] sm:$0xff]  ;;  %v3588_v37 = vld [vmem:[%s4773_s21 + $0x18] sm:$0xff]  ;;  %v3587_v27 = vld [vmem:[%s4773_s21 + $0x10] sm:$0xff] }
 0xb59   : > { %v2759_v8 = vunpack.c.l.b16 %v2751_v62  ;;  %v3586_v9 = vld [vmem:[%s4773_s21 + $0x8] sm:$0xff]  ;;  %v2758_v20 = vunpack.c.l.b16 %v2750_v28  ;;  %v3585_v7 = vld [vmem:[%s4773_s21] sm:$0xff] }
 0xb5a   : > { %v3700_v54 = vld [vmem:[%s4774_s25] ss:$0 sm:$0xff] }
 0xb5b   : > { %v2760_v13 = vrot.slane %v2759_v8, 7 }
 0xb5c   : > { %2814 = vmatpush.bf16.msra.mxu0 %v3591_v59 }
 0xb5d   : > { %v2762_v1 = vsel %vm2761_vm7, %v2760_v13, %v2758_v20 }
 0xb5e   : > { %v2763_v14 = vpack.c.b16 %v2762_v1, %v2762_v1 }
 0xb60   : > { %2815 = vmatpush.bf16.msra.mxu0 %v3590_v49 }
 0xb64   : > { %2816 = vmatpush.bf16.msra.mxu0 %v3589_v44 }
 0xb68   : > { %2817 = vmatpush.bf16.msra.mxu0 %v3588_v37 }
 0xb6c   : > { %2818 = vmatpush.bf16.msra.mxu0 %v3587_v27 }
 0xb70   : > { %2819 = vmatpush.bf16.msra.mxu0 %v3586_v9 }
 0xb74   : > { %2820 = vmatpush.bf16.msra.mxu0 %v3585_v7 }
 0xb77   : > { %2821 = vmatmul.bf16.vlgmr.msra.gmra.mxu0 %v2763_v14 }
 0xbf4   : > { %v2822_v52 = vpop.f32.mrf.mxu0 }
 0xbf5   : > { %v2823_v25 = vadd.f32 %v3700_v54, %v2822_v52 }
 0xbf7   : > { %3701 = vtanh.f32 %v2823_v25 }
 0xbfc   : > { %v2824_v12 = vpop.f32.mrf.mxu0 }
 0xbfd   : > { %v3702_v48 = vpop.eup %3701 }
 0xbfe   : > { %v2828_v10 = vrot.slane %v3702_v48, 1  ;;  %2830 = vst [vmem:[#allocation4] sm:$0x1] %v3702_v48 }
 0xc00   : > { %2831 = vst [vmem:[#allocation4 + $0x1] sm:$0x1] %v2828_v10 }
 0xc01 PF: > { %p3603_p6 = scmp.eq.s32.totalorder %s3892_s30, 1  ;;  %s3780_s20 = smov [#allocation2]  }
 0xc02   : > { %s2837_s10 = sshll.u32 %s3780_s20, 4  ;;  %s4775_s6 = sld [smem:[#allocation19_spill]]  ;;  %s2838_s10 = int_to_ptr.vmem [resolvable:$true] %s2837_s10 }
 0xc03   : > { %s3781_s22 = smov 128   ;;  %s3782_s4 = smov 8  }
 0xc04   : > { %s4776_s1 = sld [smem:[#allocation20_spill]]  ;;  %s3783_s26 = smov [#allocation4]  }
 0xc05   : > { %s2851_s19 = sshll.u32 %s3783_s26, 4  ;;  %s3784_s16 = smov 16   ;;  %s2852_s19 = int_to_ptr.vmem [resolvable:$true] %s2851_s19 }
 0xc06   : > { %s3785_s23 = smov 1  }
 0xc08   : > { %s2839_s2 = sshll.u32 %s4775_s6, 4  ;;  %s2840_s2 = int_to_ptr.hbm [resolvable:$true] %s2839_s2 }
 0xc09   : > { %3596 = dma.vmem_to_hbm [thread:$0]  (%p3603_p6), %s2838_s10, 256, %s2840_s2, [#allocation3], %s3781_s22, %s3781_s22, %s3782_s4  }
 0xc0a   : > { %s2853_s18 = sshll.u32 %s4776_s1, 4  ;;  %s2854_s18 = int_to_ptr.hbm [resolvable:$true] %s2853_s18 }
 0xc0b   : > { %3598 = dma.vmem_to_hbm [thread:$0]  (%p3603_p6), %s2852_s19, 32, %s2854_s18, [#allocation5], %s3784_s16, %s3784_s16, %s3785_s23  }
 0xc0c   : > { %3764 = dma.done.wait (%p3603_p6), [#allocation3], 256  }
 0xc0d   : > { %3766 = vsyncadd (%p3603_p6), [#allocation3], 4294967040 }
 0xc0e   : > { %3768 = dma.done.wait (%p3603_p6), [#allocation5], 32  }
 0xc0f   : > { %3770 = vsyncadd (%p3603_p6), [#allocation5], 4294967264 }
 0xc10 PF: > { %s4777_s3 = sld [smem:[#allocation8_spill]] }
 0xc16   : > { %s32_s0 = sadd.s32 1, %s4777_s3  }
 0xc17   : > { %p29_p7 = scmp.ge.s32.totalorder %s32_s0, 4  }
 0xc19   :  { %31 = sbr.rel (!%p29_p7) target bundleno = 15 (0xf), region = 168 }
 0xc1e   :  { %2875 = vsyncpa [#allocation3], 1 }
 0xc1f   :  { %2877 = vsyncpa [#allocation3 + $0x1], 1 }
 0xc20   :  { %2878 = vsyncpa [#allocation5], 1 }

</bundles_post_ra>
